<compile_context>
chip_gen: v5e
topology: v5e:2x2
jax: 0.10.0
libtpu: 0.0.40
codegen_flags: <defaults>
</compile_context>

<pallas_src>
import functools

import jax
import jax.numpy as jnp
from jax.experimental import pallas as pl
from jax.experimental.pallas import tpu as pltpu

PART = 6
EPS = 1e-5


# ---------------------------------------------------------------------------
# Kernel 1: backbone 1x1-conv matmul + ReLU + fused per-part spatial-SUM pool.
#   output block = (tm // rows_per_part, tn) pooled part-sums (the 1/(h*W)
#   mean factor is folded into the classifier weights downstream).
# ---------------------------------------------------------------------------
def _backbone_pool_single_k(x_ref, w_ref, o_ref, *, rows_per_part):
    # K fits one block: no accumulator scratch, no pl.when gates (feedback).
    y = jnp.dot(x_ref[...], w_ref[...], preferred_element_type=jnp.float32)
    y = jnp.maximum(y, 0.0)                                   # fused ReLU
    tm, tn = y.shape
    o_ref[...] = jnp.sum(
        y.reshape(tm // rows_per_part, rows_per_part, tn), axis=1)


def _backbone_pool_multi_k(x_ref, w_ref, o_ref, acc_ref, *, rows_per_part):
    @pl.when(pl.program_id(2) == 0)
    def _():
        acc_ref[...] = jnp.zeros_like(acc_ref)

    acc_ref[...] += jnp.dot(x_ref[...], w_ref[...],
                            preferred_element_type=jnp.float32)

    @pl.when(pl.program_id(2) == pl.num_programs(2) - 1)
    def _():
        y = jnp.maximum(acc_ref[...], 0.0)                    # fused ReLU
        tm, tn = y.shape
        o_ref[...] = jnp.sum(
            y.reshape(tm // rows_per_part, rows_per_part, tn), axis=1)


def run_backbone_pooled(x2d, wb, *, rows_per_part, tm=None, tn=None, tk=None):
    """x2d: (B*H*W, Cin) NHWC-flattened rows; wb: (Cin, C).

    Returns pooled part-sums (B*PART, C) in f32 (row index = b*PART + p).
    """
    M, K = x2d.shape
    K2, C = wb.shape
    assert K == K2
    assert M % rows_per_part == 0

    # --- tile selection: prefer 512/256 (MXU-filling on v6e/v7x) ------------
    if tm is None:
        for cand in (512, 256):
            if (M % cand == 0 and cand % rows_per_part == 0
                    and (cand // rows_per_part) % 8 == 0):
                tm = cand
                break
        else:
            tm = M
    if tn is None:
        tn = next((c for c in (512, 256, 128) if C % c == 0), C)
    if tk is None:
        tk = next((c for c in (1024, 512, 256) if K % c == 0), K)

    assert M % tm == 0 and C % tn == 0 and K % tk == 0, (M, C, K, tm, tn, tk)
    assert tm % rows_per_part == 0, "a tile must not straddle a part boundary"
    assert tm % 8 == 0 or tm == M
    assert tn % 128 == 0 or tn == C
    assert tk % 128 == 0 or tk == K
    rows_out = tm // rows_per_part
    assert rows_out % 8 == 0 or tm == M, "pooled out-block sublane constraint"

    kgrid = K // tk
    grid = (M // tm, C // tn, kgrid)

    kernel = functools.partial(
        _backbone_pool_single_k if kgrid == 1 else _backbone_pool_multi_k,
        rows_per_part=rows_per_part)
    scratch = [] if kgrid == 1 else [pltpu.VMEM((tm, tn), jnp.float32)]

    # vmem limit from actual buffer math + margin (feedback: not a flat 48MiB)
    in_item = x2d.dtype.itemsize
    work_bytes = (2 * (tm * tk + tk * tn) * in_item      # double-buffered inputs
                  + 2 * rows_out * tn * 4                # double-buffered output
                  + (0 if kgrid == 1 else tm * tn * 4)   # f32 accumulator
                  + tm * tn * 4)                         # epilogue temporaries
    vmem_limit = int(max(16 * 1024 * 1024, 2 * work_bytes + 4 * 1024 * 1024))

    return pl.pallas_call(
        kernel,
        out_shape=jax.ShapeDtypeStruct((M // rows_per_part, C), jnp.float32),
        grid_spec=pltpu.PrefetchScalarGridSpec(
            num_scalar_prefetch=0,
            grid=grid,
            in_specs=[
                pl.BlockSpec((tm, tk), lambda i, j, k: (i, k)),
                pl.BlockSpec((tk, tn), lambda i, j, k: (k, j)),
            ],
            out_specs=pl.BlockSpec((rows_out, tn), lambda i, j, k: (i, j)),
            scratch_shapes=scratch,
        ),
        compiler_params=pltpu.CompilerParams(
            dimension_semantics=("parallel", "parallel", "arbitrary"),
            vmem_limit_bytes=vmem_limit,
        ),
    )(x2d, wb)


# ---------------------------------------------------------------------------
# Kernel 2: per-part classifier add_block on the pooled features.
#   Conv1x1 (BN scale + 1/(h*W) folded into the weight) -> BN shift -> LeakyReLU.
#   grid=(PART,) parallel; each step reads only (B, C) + (C, N) + (1, N).
# ---------------------------------------------------------------------------
def part_classifier_kernel(x_ref, w_ref, shift_ref, o_ref):
    # x_ref: (1, B, C)  w_ref: (1, C, N)  shift_ref: (1, 1, N)  o_ref: (1, B, N)
    y = jnp.dot(x_ref[0], w_ref[0], preferred_element_type=jnp.float32)
    y = y + shift_ref[0]                        # BatchNorm2d (eval) shift, f32
    o_ref[0] = jnp.where(y > 0.0, y, 0.1 * y)   # LeakyReLU(0.1); Dropout = id


def run_part_classifiers(pooled_pbc, w_folded, shift):
    # pooled_pbc: (PART, B, C); w_folded: (PART, C, N); shift: (PART, 1, N)
    P_, B, C = pooled_pbc.shape
    N = w_folded.shape[-1]
    flops = 2 * P_ * B * C * N
    bytes_accessed = int(pooled_pbc.size * pooled_pbc.dtype.itemsize
                         + w_folded.size * w_folded.dtype.itemsize
                         + shift.size * 4 + P_ * B * N * 4)
    return pl.pallas_call(
        part_classifier_kernel,
        out_shape=jax.ShapeDtypeStruct((P_, B, N), jnp.float32),
        grid=(P_,),
        in_specs=[
            pl.BlockSpec((1, B, C), lambda p: (p, 0, 0)),
            pl.BlockSpec((1, C, N), lambda p: (p, 0, 0)),
            pl.BlockSpec((1, 1, N), lambda p: (p, 0, 0)),
        ],
        out_specs=pl.BlockSpec((1, B, N), lambda p: (p, 0, 0)),
        compiler_params=pltpu.CompilerParams(
            dimension_semantics=("parallel",)),
        # stage is latency/DMA-bound, not MXU-bound; hint XLA's scheduler.
        cost_estimate=pl.CostEstimate(flops=flops, transcendentals=0,
                                      bytes_accessed=bytes_accessed),
    )(pooled_pbc, w_folded, shift)


# ---------------------------------------------------------------------------
# Full forward (glue in plain JAX: free reshape, BN/pool folding, tiny transposes)
# ---------------------------------------------------------------------------
def pcb_test_forward(x_nhwc, params, *, matmul_dtype=jnp.float32,
                     tm=None, tn=None, tk=None):
    # NHWC input so the (B*H*W, Cin) matmul view is a FREE reshape; the
    # previous full-activation NCHW->NHWC host transpose is gone (the original
    # PyTorch module takes NCHW; convert upstream / in the data pipeline).
    B, H, W, Cin = x_nhwc.shape
    assert H % PART == 0, "spatial H must be divisible by 6 for the 6-part pool"
    h = H // PART
    hw = h * W
    C = params["wb"].shape[1]

    x2d = x_nhwc.reshape(B * H * W, Cin).astype(matmul_dtype)
    wb = params["wb"].astype(matmul_dtype)

    # Kernel 1: backbone matmul + ReLU + fused per-part spatial-sum pooling.
    pooled = run_backbone_pooled(x2d, wb, rows_per_part=hw,
                                 tm=tm, tn=tn, tk=tk)          # (B*PART, C) f32

    # tiny (~KB) layout shuffle so the classifier grid slices the part axis.
    pooled_pbc = jnp.transpose(pooled.reshape(B, PART, C), (1, 0, 2))

    # fold BN running stats (eval) + 1/(h*W) pool mean into the conv weights.
    inv_std = 1.0 / jnp.sqrt(params["rvar"] + EPS)             # (6, N)
    scale = params["gamma"] * inv_std                          # (6, N)
    w_folded = (params["wparts"]
                * (scale / float(hw))[:, None, :]).astype(matmul_dtype)
    shift = (params["beta"] - params["rmean"] * scale)[:, None, :]   # f32

    out_pbn = run_part_classifiers(pooled_pbc.astype(matmul_dtype),
                                   w_folded, shift)            # (PART, B, N)
    # PyTorch: cat along dim 2 then view -> (B, N, 6).  One tiny XLA transpose
    # (lane-sparse last-dim-6 stores never happen inside a kernel).
    return jnp.transpose(out_pbn, (1, 2, 0))


# ---------------------------------------------------------------------------
# Plain-JAX reference (PyTorch eval-graph semantics) for verification
# ---------------------------------------------------------------------------
def pcb_test_reference(x_nhwc, params):
    B, H, W, Cin = x_nhwc.shape
    h = H // PART
    y = jnp.einsum("bhwc,cd->bhwd", x_nhwc, params["wb"],
                   precision=jax.lax.Precision.HIGHEST)
    y = jnp.maximum(y, 0.0)
    C = y.shape[-1]
    pooled = y.reshape(B, PART, h * W, C).mean(axis=2)         # (B, 6, C)
    outs = []
    for i in range(PART):
        p = pooled[:, i, :]                                    # (B, C)
        z = jnp.dot(p, params["wparts"][i],
                    precision=jax.lax.Precision.HIGHEST)       # (B, N)
        z = (z - params["rmean"][i]) / jnp.sqrt(params["rvar"][i] + EPS) \
            * params["gamma"][i] + params["beta"][i]
        z = jnp.where(z > 0, z, 0.1 * z)
        outs.append(z[:, :, None])
    return jnp.concatenate(outs, axis=2)                       # (B, N, 6)


if __name__ == "__main__":
    # small but tile-friendly shapes: batch=2, input channels=256,
    # spatial 24x8 (6 parts of 4x8), backbone channels=256, bottleneck N=128
    B, H, W, Cin = 2, 24, 8, 256
    C, N = 256, 128

    key = jax.random.PRNGKey(0)
    ks = jax.random.split(key, 7)
    x_nhwc = jax.random.normal(ks[0], (B, H, W, Cin), dtype=jnp.float32)

    params = {
        "wb": jax.random.normal(ks[1], (Cin, C), dtype=jnp.float32) * 0.05,
        "wparts": jax.random.normal(ks[2], (PART, C, N), dtype=jnp.float32) * 0.05,
        "gamma": jax.random.uniform(ks[3], (PART, N), minval=0.5, maxval=1.5,
                                    dtype=jnp.float32),
        "beta": jax.random.normal(ks[4], (PART, N), dtype=jnp.float32) * 0.1,
        "rmean": jax.random.normal(ks[5], (PART, N), dtype=jnp.float32) * 0.1,
        "rvar": jax.random.uniform(ks[6], (PART, N), minval=0.5, maxval=1.5,
                                   dtype=jnp.float32),
    }

    ref = jax.block_until_ready(pcb_test_reference(x_nhwc, params))

    # f32 verification: exercises both the single-k bypass path (tk=K) and the
    # multi-k accumulator path (tk=128).
    out_a = jax.block_until_ready(pcb_test_forward(x_nhwc, params))
    out_b = jax.block_until_ready(pcb_test_forward(x_nhwc, params, tk=128))
    assert out_a.shape == (B, N, PART), out_a.shape
    assert out_b.shape == (B, N, PART), out_b.shape
    for name, o in (("f32/single-k", out_a), ("f32/multi-k", out_b)):
        max_err = float(jnp.max(jnp.abs(o - ref)))
        assert jnp.allclose(o, ref, rtol=2e-3, atol=2e-3), (name, max_err)

    # bf16 MXU-operand path (production config on v5e/v6e/v7x): f32 accumulate,
    # f32 epilogues; checked against the f32 reference at bf16-level tolerance.
    out_bf = jax.block_until_ready(
        pcb_test_forward(x_nhwc, params, matmul_dtype=jnp.bfloat16))
    max_err_bf = float(jnp.max(jnp.abs(out_bf - ref)))
    assert jnp.allclose(out_bf, ref, rtol=5e-2, atol=5e-2), ("bf16", max_err_bf)

    print("KERNEL_OK")
</pallas_src>

<mosaic_0001>
module attributes {stable_mosaic.version = 11 : i64} {
  func.func @_backbone_pool_single_k(%arg0: i32, %arg1: i32, %arg2: i32, %arg3: memref<384x256xf32, #tpu.memory_space<vmem>>, %arg4: memref<256x256xf32, #tpu.memory_space<vmem>>, %arg5: memref<12x256xf32, #tpu.memory_space<vmem>>) attributes {dimension_semantics = [#tpu.dimension_semantics<parallel>, #tpu.dimension_semantics<parallel>, #tpu.dimension_semantics<arbitrary>], iteration_bounds = array<i64: 1, 1, 1>, scalar_prefetch = 0 : i64, scratch_operands = 0 : i64, tpu.core_type = #tpu.core_type<tc>, window_params = [{transform_indices = @transform_0, window_bounds = array<i64: 384, 256>}, {transform_indices = @transform_1, window_bounds = array<i64: 256, 256>}, {transform_indices = @transform_2, window_bounds = array<i64: 12, 256>}]} {
    %c0 = arith.constant 0 : index
    %c0_0 = arith.constant 0 : index
    %0 = vector.load %arg3[%c0, %c0_0] : memref<384x256xf32, #tpu.memory_space<vmem>>, vector<384x256xf32>
    %c0_1 = arith.constant 0 : index
    %c0_2 = arith.constant 0 : index
    %1 = vector.load %arg4[%c0_1, %c0_2] : memref<256x256xf32, #tpu.memory_space<vmem>>, vector<256x256xf32>
    %cst = arith.constant dense<0.000000e+00> : vector<384x256xf32>
    %2 = tpu.matmul %0, %1, %cst {dimension_numbers = #tpu.dot_dimension_numbers<[1], [0], [0], [1], [0, 0, 1, 1], [], []>} : vector<384x256xf32>, vector<256x256xf32>, vector<384x256xf32> -> vector<384x256xf32>
    %cst_3 = arith.constant 0.000000e+00 : f32
    %3 = vector.broadcast %cst_3 : f32 to vector<384x256xf32>
    %4 = arith.maximumf %2, %3 : vector<384x256xf32>
    %5 = vector.shape_cast %4 : vector<384x256xf32> to vector<12x32x256xf32>
    %cst_4 = arith.constant dense<0.000000e+00> : vector<12x256xf32>
    %6 = vector.multi_reduction <add>, %5, %cst_4 [1] : vector<12x32x256xf32> to vector<12x256xf32>
    %c0_5 = arith.constant 0 : index
    %c0_6 = arith.constant 0 : index
    %7 = vector.load %arg5[%c0_5, %c0_6] : memref<12x256xf32, #tpu.memory_space<vmem>>, vector<12x256xf32>
    tpu.vector_store %arg5[%c0_5, %c0_6], %6 {strides = array<i32>} : memref<12x256xf32, #tpu.memory_space<vmem>>, vector<12x256xf32>,
    return
  }
  func.func @transform_0(%arg0: i32, %arg1: i32, %arg2: i32) -> (i32, i32) {
    %c0_i32 = arith.constant 0 : i32
    return %arg0, %arg2 : i32, i32
  }
  func.func @transform_1(%arg0: i32, %arg1: i32, %arg2: i32) -> (i32, i32) {
    %c0_i32 = arith.constant 0 : i32
    return %arg2, %arg1 : i32, i32
  }
  func.func @transform_2(%arg0: i32, %arg1: i32, %arg2: i32) -> (i32, i32) {
    %c0_i32 = arith.constant 0 : i32
    return %arg0, %arg1 : i32, i32
  }
}

</mosaic_0001>

<bundles_post_ra>
// kernel: tpu_custom_call.1
= control target key start
LH: loop header
LB: loop body
LE: loop exit
PB: predicated region body
PF: predicated region fallthrough
CT: control target
= control target key end

     0   :  { %7 = vsyncpa [#allocation3], 0  ;;  %s1595_s0 = inlined_call_operand.hbm [shape: f32[384,256], index: 0, kind: input, shape index: {}]   ;;  %s1596_s1 = inlined_call_operand.hbm [shape: f32[256,256], index: 1, kind: input, shape index: {}]   ;;  %s1597_s2 = inlined_call_operand.hbm [shape: f32[12,256], index: 2, kind: output, shape index: {}]  }
   0x1   :  { %8 = vsyncpa [#allocation6], 0 }
   0x2   :  { %9 = vsyncpa [#allocation4], 0  ;;  %s14_s11 = sshll.u32 %s1595_s0, 4  ;;  %s1322_s12 = smov [#allocation2]   ;;  %s15_s11 = int_to_ptr.hbm [resolvable:$true] %s14_s11 }
   0x3   :  { %s16_s13 = sshll.u32 %s1322_s12, 4  ;;  %s27_s16 = sshll.u32 %s1596_s1, 4  ;;  %s17_s13 = int_to_ptr.vmem [resolvable:$true] %s16_s13  ;;  %s28_s16 = int_to_ptr.hbm [resolvable:$true] %s27_s16 }
   0x4   :  { %s1323_s17 = smov 256   ;;  %s1324_s18 = smov 16  }
   0x5   :  { %22 = dma.hbm_to_vmem [thread:$0]  %s15_s11, 12288, %s17_s13, [#allocation3], %s1323_s17, %s1323_s17, %s1324_s18  }
   0x6   :  { %s1325_s19 = smov [#allocation5]  }
   0x7   :  { %s29_s20 = sshll.u32 %s1325_s19, 4  ;;  %s30_s20 = int_to_ptr.vmem [resolvable:$true] %s29_s20 }
   0x8   :  { %35 = dma.hbm_to_vmem [thread:$0]  %s28_s16, 8192, %s30_s20, [#allocation6], %s1323_s17, %s1323_s17, %s1324_s18  }
   0x9   :  { %1316 = dma.done.wait [#allocation3], 12288  }
   0xa   :  { %1317 = vsyncadd [#allocation3], 4294955008 }
   0xb   :  { %1318 = dma.done.wait [#allocation6], 8192  }
   0xc   :  { %1319 = vsyncadd [#allocation6], 4294959104  ;;  %v170_v0 = vld [vmem:[#allocation5 + $0xf0] sm:$0xff]  ;;  %v171_v2 = vld [vmem:[#allocation5 + $0xf8] sm:$0xff]  ;;  %vm1184_vm0 = vcmask 1041409   ;;  %vm1186_vm1 = vcmask 1042434  }
   0xd   :  { %v202_v1 = vld [vmem:[#allocation5 + $0x1f0] sm:$0xff]  ;;  %204 = vmatpush.msra.mxu0 %v170_v0  ;;  %v203_v3 = vld [vmem:[#allocation5 + $0x1f8] sm:$0xff]  ;;  %v168_v4 = vld [vmem:[#allocation5 + $0xe0] sm:$0xff]  ;;  %526 = vmatpush.msra.mxu2 %v171_v2  ;;  %vm1188_vm2 = vcmask 1043459   ;;  %vm1190_vm3 = vcmask 1044484   ;;  %vm1192_vm4 = vcmask 1045509  }
   0xe   :  { %365 = vmatpush.msra.mxu1 %v202_v1  ;;  %v200_v5 = vld [vmem:[#allocation5 + $0x1e0] sm:$0xff]  ;;  %687 = vmatpush.msra.mxu3 %v203_v3  ;;  %v169_v6 = vld [vmem:[#allocation5 + $0xe8] sm:$0xff]  ;;  %v166_v8 = vld [vmem:[#allocation5 + $0xd0] sm:$0xff]  ;;  %vm1194_vm5 = vcmask 1046534   ;;  %vm1196_vm6 = vcmask 1047559   ;;  %s1326_s0 = smov [#allocation7]  }
   0xf   :  { %v201_v7 = vld [vmem:[#allocation5 + $0x1e8] sm:$0xff]  ;;  %205 = vmatpush.msra.mxu0 %v168_v4  ;;  %v198_v9 = vld [vmem:[#allocation5 + $0x1d0] sm:$0xff]  ;;  %v167_v10 = vld [vmem:[#allocation5 + $0xd8] sm:$0xff]  ;;  %527 = vmatpush.msra.mxu2 %v169_v6  ;;  %s1223_s1 = sshll.u32 %s1326_s0, 4  ;;  %s1225_s23 = sshll.u32 %s1597_s2, 4  ;;  %s1224_s1 = int_to_ptr.vmem [resolvable:$true] %s1223_s1  ;;  %s1226_s23 = int_to_ptr.hbm [resolvable:$true] %s1225_s23 }
  0x10   :  { %366 = vmatpush.msra.mxu1 %v200_v5  ;;  %v199_v11 = vld [vmem:[#allocation5 + $0x1d8] sm:$0xff]  ;;  %688 = vmatpush.msra.mxu3 %v201_v7  ;;  %v164_v12 = vld [vmem:[#allocation5 + $0xc0] sm:$0xff]  ;;  %v165_v14 = vld [vmem:[#allocation5 + $0xc8] sm:$0xff] }
  0x11   :  { %v196_v13 = vld [vmem:[#allocation5 + $0x1c0] sm:$0xff]  ;;  %206 = vmatpush.msra.mxu0 %v166_v8  ;;  %v197_v15 = vld [vmem:[#allocation5 + $0x1c8] sm:$0xff]  ;;  %528 = vmatpush.msra.mxu2 %v167_v10  ;;  %v162_v16 = vld [vmem:[#allocation5 + $0xb0] sm:$0xff] }
  0x12   :  { %367 = vmatpush.msra.mxu1 %v198_v9  ;;  %689 = vmatpush.msra.mxu3 %v199_v11  ;;  %v194_v17 = vld [vmem:[#allocation5 + $0x1b0] sm:$0xff]  ;;  %v163_v18 = vld [vmem:[#allocation5 + $0xb8] sm:$0xff]  ;;  %v160_v20 = vld [vmem:[#allocation5 + $0xa0] sm:$0xff] }
  0x13   :  { %207 = vmatpush.msra.mxu0 %v164_v12  ;;  %v195_v19 = vld [vmem:[#allocation5 + $0x1b8] sm:$0xff]  ;;  %529 = vmatpush.msra.mxu2 %v165_v14  ;;  %v192_v21 = vld [vmem:[#allocation5 + $0x1a0] sm:$0xff]  ;;  %v161_v22 = vld [vmem:[#allocation5 + $0xa8] sm:$0xff] }
  0x14   :  { %368 = vmatpush.msra.mxu1 %v196_v13  ;;  %690 = vmatpush.msra.mxu3 %v197_v15  ;;  %v193_v23 = vld [vmem:[#allocation5 + $0x1a8] sm:$0xff]  ;;  %v158_v24 = vld [vmem:[#allocation5 + $0x90] sm:$0xff]  ;;  %v159_v26 = vld [vmem:[#allocation5 + $0x98] sm:$0xff] }
  0x15   :  { %208 = vmatpush.msra.mxu0 %v162_v16  ;;  %530 = vmatpush.msra.mxu2 %v163_v18  ;;  %v190_v25 = vld [vmem:[#allocation5 + $0x190] sm:$0xff]  ;;  %v191_v27 = vld [vmem:[#allocation5 + $0x198] sm:$0xff]  ;;  %v156_v28 = vld [vmem:[#allocation5 + $0x80] sm:$0xff] }
  0x16   :  { %369 = vmatpush.msra.mxu1 %v194_v17  ;;  %691 = vmatpush.msra.mxu3 %v195_v19  ;;  %v188_v29 = vld [vmem:[#allocation5 + $0x180] sm:$0xff]  ;;  %v157_v30 = vld [vmem:[#allocation5 + $0x88] sm:$0xff]  ;;  %v154_v32 = vld [vmem:[#allocation5 + $0x70] sm:$0xff] }
  0x17   :  { %209 = vmatpush.msra.mxu0 %v160_v20  ;;  %531 = vmatpush.msra.mxu2 %v161_v22  ;;  %v189_v31 = vld [vmem:[#allocation5 + $0x188] sm:$0xff]  ;;  %v186_v33 = vld [vmem:[#allocation5 + $0x170] sm:$0xff]  ;;  %v155_v34 = vld [vmem:[#allocation5 + $0x78] sm:$0xff] }
  0x18   :  { %370 = vmatpush.msra.mxu1 %v192_v21  ;;  %692 = vmatpush.msra.mxu3 %v193_v23  ;;  %v187_v35 = vld [vmem:[#allocation5 + $0x178] sm:$0xff]  ;;  %v152_v36 = vld [vmem:[#allocation5 + $0x60] sm:$0xff]  ;;  %v153_v38 = vld [vmem:[#allocation5 + $0x68] sm:$0xff] }
  0x19   :  { %210 = vmatpush.msra.mxu0 %v158_v24  ;;  %532 = vmatpush.msra.mxu2 %v159_v26  ;;  %v184_v37 = vld [vmem:[#allocation5 + $0x160] sm:$0xff]  ;;  %v185_v39 = vld [vmem:[#allocation5 + $0x168] sm:$0xff]  ;;  %v150_v40 = vld [vmem:[#allocation5 + $0x50] sm:$0xff] }
  0x1a   :  { %371 = vmatpush.msra.mxu1 %v190_v25  ;;  %693 = vmatpush.msra.mxu3 %v191_v27  ;;  %v182_v41 = vld [vmem:[#allocation5 + $0x150] sm:$0xff]  ;;  %v151_v42 = vld [vmem:[#allocation5 + $0x58] sm:$0xff]  ;;  %v148_v44 = vld [vmem:[#allocation5 + $0x40] sm:$0xff] }
  0x1b   :  { %211 = vmatpush.msra.mxu0 %v156_v28  ;;  %533 = vmatpush.msra.mxu2 %v157_v30  ;;  %v183_v43 = vld [vmem:[#allocation5 + $0x158] sm:$0xff]  ;;  %v180_v45 = vld [vmem:[#allocation5 + $0x140] sm:$0xff]  ;;  %v149_v46 = vld [vmem:[#allocation5 + $0x48] sm:$0xff] }
  0x1c   :  { %372 = vmatpush.msra.mxu1 %v188_v29  ;;  %694 = vmatpush.msra.mxu3 %v189_v31  ;;  %v181_v47 = vld [vmem:[#allocation5 + $0x148] sm:$0xff]  ;;  %v146_v48 = vld [vmem:[#allocation5 + $0x30] sm:$0xff]  ;;  %v147_v50 = vld [vmem:[#allocation5 + $0x38] sm:$0xff] }
  0x1d   :  { %212 = vmatpush.msra.mxu0 %v154_v32  ;;  %534 = vmatpush.msra.mxu2 %v155_v34  ;;  %v178_v49 = vld [vmem:[#allocation5 + $0x130] sm:$0xff]  ;;  %v179_v51 = vld [vmem:[#allocation5 + $0x138] sm:$0xff]  ;;  %v144_v52 = vld [vmem:[#allocation5 + $0x20] sm:$0xff] }
  0x1e   :  { %373 = vmatpush.msra.mxu1 %v186_v33  ;;  %695 = vmatpush.msra.mxu3 %v187_v35  ;;  %v176_v53 = vld [vmem:[#allocation5 + $0x120] sm:$0xff]  ;;  %v145_v54 = vld [vmem:[#allocation5 + $0x28] sm:$0xff]  ;;  %v142_v56 = vld [vmem:[#allocation5 + $0x10] sm:$0xff] }
  0x1f   :  { %213 = vmatpush.msra.mxu0 %v152_v36  ;;  %535 = vmatpush.msra.mxu2 %v153_v38  ;;  %v177_v55 = vld [vmem:[#allocation5 + $0x128] sm:$0xff]  ;;  %v174_v57 = vld [vmem:[#allocation5 + $0x110] sm:$0xff]  ;;  %v143_v58 = vld [vmem:[#allocation5 + $0x18] sm:$0xff] }
  0x20   :  { %374 = vmatpush.msra.mxu1 %v184_v37  ;;  %696 = vmatpush.msra.mxu3 %v185_v39  ;;  %v175_v59 = vld [vmem:[#allocation5 + $0x118] sm:$0xff]  ;;  %v140_v60 = vld [vmem:[#allocation5] sm:$0xff]  ;;  %v141_v62 = vld [vmem:[#allocation5 + $0x8] sm:$0xff] }
  0x21   :  { %214 = vmatpush.msra.mxu0 %v150_v40  ;;  %536 = vmatpush.msra.mxu2 %v151_v42  ;;  %v172_v61 = vld [vmem:[#allocation5 + $0x100] sm:$0xff]  ;;  %v173_v63 = vld [vmem:[#allocation5 + $0x108] sm:$0xff]  ;;  %v46_v2 = vld [vmem:[#allocation2 + $0x10] sm:$0xff] }
  0x22   :  { %375 = vmatpush.msra.mxu1 %v182_v41  ;;  %697 = vmatpush.msra.mxu3 %v183_v43  ;;  %v44_v0 = vld [vmem:[#allocation2] sm:$0xff]  ;;  %v45_v1 = vld [vmem:[#allocation2 + $0x8] sm:$0xff]  ;;  %v47_v3 = vld [vmem:[#allocation2 + $0x18] sm:$0xff] }
  0x23   :  { %215 = vmatpush.msra.mxu0 %v148_v44  ;;  %537 = vmatpush.msra.mxu2 %v149_v46  ;;  %v48_v4 = vld [vmem:[#allocation2 + $0x20] sm:$0xff]  ;;  %v49_v5 = vld [vmem:[#allocation2 + $0x28] sm:$0xff]  ;;  %v50_v6 = vld [vmem:[#allocation2 + $0x30] sm:$0xff] }
  0x24   :  { %376 = vmatpush.msra.mxu1 %v180_v45  ;;  %698 = vmatpush.msra.mxu3 %v181_v47  ;;  %v51_v7 = vld [vmem:[#allocation2 + $0x38] sm:$0xff]  ;;  %v52_v8 = vld [vmem:[#allocation2 + $0x40] sm:$0xff]  ;;  %v53_v9 = vld [vmem:[#allocation2 + $0x48] sm:$0xff] }
  0x25   :  { %216 = vmatpush.msra.mxu0 %v146_v48  ;;  %538 = vmatpush.msra.mxu2 %v147_v50  ;;  %v54_v10 = vld [vmem:[#allocation2 + $0x50] sm:$0xff]  ;;  %v55_v11 = vld [vmem:[#allocation2 + $0x58] sm:$0xff]  ;;  %v56_v12 = vld [vmem:[#allocation2 + $0x60] sm:$0xff] }
  0x26   :  { %377 = vmatpush.msra.mxu1 %v178_v49  ;;  %699 = vmatpush.msra.mxu3 %v179_v51  ;;  %v57_v13 = vld [vmem:[#allocation2 + $0x68] sm:$0xff]  ;;  %v58_v14 = vld [vmem:[#allocation2 + $0x70] sm:$0xff]  ;;  %v59_v15 = vld [vmem:[#allocation2 + $0x78] sm:$0xff] }
  0x27   :  { %217 = vmatpush.msra.mxu0 %v144_v52  ;;  %539 = vmatpush.msra.mxu2 %v145_v54  ;;  %v60_v16 = vld [vmem:[#allocation2 + $0x80] sm:$0xff]  ;;  %v61_v17 = vld [vmem:[#allocation2 + $0x88] sm:$0xff]  ;;  %v62_v18 = vld [vmem:[#allocation2 + $0x90] sm:$0xff] }
  0x28   :  { %378 = vmatpush.msra.mxu1 %v176_v53  ;;  %700 = vmatpush.msra.mxu3 %v177_v55  ;;  %v63_v19 = vld [vmem:[#allocation2 + $0x98] sm:$0xff]  ;;  %v64_v20 = vld [vmem:[#allocation2 + $0xa0] sm:$0xff]  ;;  %v65_v21 = vld [vmem:[#allocation2 + $0xa8] sm:$0xff] }
  0x29   :  { %218 = vmatpush.msra.mxu0 %v142_v56  ;;  %540 = vmatpush.msra.mxu2 %v143_v58  ;;  %v66_v22 = vld [vmem:[#allocation2 + $0xb0] sm:$0xff]  ;;  %v67_v23 = vld [vmem:[#allocation2 + $0xb8] sm:$0xff]  ;;  %v68_v24 = vld [vmem:[#allocation2 + $0xc0] sm:$0xff] }
  0x2a   :  { %379 = vmatpush.msra.mxu1 %v174_v57  ;;  %701 = vmatpush.msra.mxu3 %v175_v59  ;;  %v69_v25 = vld [vmem:[#allocation2 + $0xc8] sm:$0xff]  ;;  %v70_v26 = vld [vmem:[#allocation2 + $0xd0] sm:$0xff]  ;;  %v71_v27 = vld [vmem:[#allocation2 + $0xd8] sm:$0xff] }
  0x2b   :  { %219 = vmatpush.msra.mxu0 %v140_v60  ;;  %541 = vmatpush.msra.mxu2 %v141_v62  ;;  %v72_v28 = vld [vmem:[#allocation2 + $0xe0] sm:$0xff]  ;;  %v73_v29 = vld [vmem:[#allocation2 + $0xe8] sm:$0xff]  ;;  %v74_v30 = vld [vmem:[#allocation2 + $0xf0] sm:$0xff] }
  0x2c   :  { %380 = vmatpush.msra.mxu1 %v172_v61  ;;  %702 = vmatpush.msra.mxu3 %v173_v63  ;;  %v75_v31 = vld [vmem:[#allocation2 + $0xf8] sm:$0xff]  ;;  %v76_v34 = vld [vmem:[#allocation2 + $0x100] sm:$0xff]  ;;  %v77_v35 = vld [vmem:[#allocation2 + $0x108] sm:$0xff] }
  0x2d   :  { %220 = vmatmul.f32.vlgmr.msra.gmra.mxu0 %v44_v0  ;;  %381 = vmatmul.f32.vlgmr.msra.gmra.mxu1 %v45_v1  ;;  %v78_v41 = vld [vmem:[#allocation2 + $0x110] sm:$0xff]  ;;  %v79_v42 = vld [vmem:[#allocation2 + $0x118] sm:$0xff]  ;;  %v80_v48 = vld [vmem:[#allocation2 + $0x120] sm:$0xff] }
  0x2e   :  { %542 = vmatmul.f32.vlgmr.msra.gmra.mxu2 %v44_v0  ;;  %703 = vmatmul.f32.vlgmr.msra.gmra.mxu3 %v45_v1  ;;  %v81_v49 = vld [vmem:[#allocation2 + $0x128] sm:$0xff]  ;;  %v82_v58 = vld [vmem:[#allocation2 + $0x130] sm:$0xff]  ;;  %v83_v59 = vld [vmem:[#allocation2 + $0x138] sm:$0xff] }
  0x35   :  { %223 = vmatmul.f32.gmra.mxu0 %v46_v2  ;;  %384 = vmatmul.f32.gmra.mxu1 %v47_v3 }
  0x36   :  { %545 = vmatmul.f32.gmra.mxu2 %v46_v2  ;;  %706 = vmatmul.f32.gmra.mxu3 %v47_v3  ;;  %v84_v3 = vld [vmem:[#allocation2 + $0x140] sm:$0xff] }
  0x3d   :  { %226 = vmatmul.f32.gmra.mxu0 %v48_v4  ;;  %387 = vmatmul.f32.gmra.mxu1 %v49_v5 }
  0x3e   :  { %548 = vmatmul.f32.gmra.mxu2 %v48_v4  ;;  %709 = vmatmul.f32.gmra.mxu3 %v49_v5  ;;  %v85_v4 = vld [vmem:[#allocation2 + $0x148] sm:$0xff] }
  0x45   :  { %229 = vmatmul.f32.gmra.mxu0 %v50_v6  ;;  %390 = vmatmul.f32.gmra.mxu1 %v51_v7 }
  0x46   :  { %551 = vmatmul.f32.gmra.mxu2 %v50_v6  ;;  %712 = vmatmul.f32.gmra.mxu3 %v51_v7 }
  0x4d   :  { %232 = vmatmul.f32.gmra.mxu0 %v52_v8  ;;  %393 = vmatmul.f32.gmra.mxu1 %v53_v9 }
  0x4e   :  { %554 = vmatmul.f32.gmra.mxu2 %v52_v8  ;;  %715 = vmatmul.f32.gmra.mxu3 %v53_v9 }
  0x55   :  { %235 = vmatmul.f32.gmra.mxu0 %v54_v10  ;;  %396 = vmatmul.f32.gmra.mxu1 %v55_v11 }
  0x56   :  { %557 = vmatmul.f32.gmra.mxu2 %v54_v10  ;;  %718 = vmatmul.f32.gmra.mxu3 %v55_v11 }
  0x5d   :  { %238 = vmatmul.f32.gmra.mxu0 %v56_v12  ;;  %399 = vmatmul.f32.gmra.mxu1 %v57_v13 }
  0x5e   :  { %560 = vmatmul.f32.gmra.mxu2 %v56_v12  ;;  %721 = vmatmul.f32.gmra.mxu3 %v57_v13  ;;  %v86_v12 = vld [vmem:[#allocation2 + $0x150] sm:$0xff]  ;;  %v87_v13 = vld [vmem:[#allocation2 + $0x158] sm:$0xff] }
  0x65   :  { %241 = vmatmul.f32.gmra.mxu0 %v58_v14  ;;  %402 = vmatmul.f32.gmra.mxu1 %v59_v15 }
  0x66   :  { %563 = vmatmul.f32.gmra.mxu2 %v58_v14  ;;  %724 = vmatmul.f32.gmra.mxu3 %v59_v15 }
  0x6d   :  { %244 = vmatmul.f32.gmra.mxu0 %v60_v16  ;;  %405 = vmatmul.f32.gmra.mxu1 %v61_v17 }
  0x6e   :  { %566 = vmatmul.f32.gmra.mxu2 %v60_v16  ;;  %727 = vmatmul.f32.gmra.mxu3 %v61_v17 }
  0x75   :  { %247 = vmatmul.f32.gmra.mxu0 %v62_v18  ;;  %408 = vmatmul.f32.gmra.mxu1 %v63_v19 }
  0x76   :  { %569 = vmatmul.f32.gmra.mxu2 %v62_v18  ;;  %730 = vmatmul.f32.gmra.mxu3 %v63_v19  ;;  %v88_v19 = vld [vmem:[#allocation2 + $0x160] sm:$0xff] }
  0x7d   :  { %250 = vmatmul.f32.gmra.mxu0 %v64_v20  ;;  %411 = vmatmul.f32.gmra.mxu1 %v65_v21 }
  0x7e   :  { %572 = vmatmul.f32.gmra.mxu2 %v64_v20  ;;  %733 = vmatmul.f32.gmra.mxu3 %v65_v21  ;;  %v89_v20 = vld [vmem:[#allocation2 + $0x168] sm:$0xff] }
  0x85   :  { %253 = vmatmul.f32.gmra.mxu0 %v66_v22  ;;  %414 = vmatmul.f32.gmra.mxu1 %v67_v23 }
  0x86   :  { %575 = vmatmul.f32.gmra.mxu2 %v66_v22  ;;  %736 = vmatmul.f32.gmra.mxu3 %v67_v23 }
  0x8d   :  { %256 = vmatmul.f32.gmra.mxu0 %v68_v24  ;;  %417 = vmatmul.f32.gmra.mxu1 %v69_v25 }
  0x8e   :  { %578 = vmatmul.f32.gmra.mxu2 %v68_v24  ;;  %739 = vmatmul.f32.gmra.mxu3 %v69_v25 }
  0x95   :  { %259 = vmatmul.f32.gmra.mxu0 %v70_v26  ;;  %420 = vmatmul.f32.gmra.mxu1 %v71_v27 }
  0x96   :  { %581 = vmatmul.f32.gmra.mxu2 %v70_v26  ;;  %742 = vmatmul.f32.gmra.mxu3 %v71_v27 }
  0x9d   :  { %262 = vmatmul.f32.gmra.mxu0 %v72_v28  ;;  %423 = vmatmul.f32.gmra.mxu1 %v73_v29 }
  0x9e   :  { %584 = vmatmul.f32.gmra.mxu2 %v72_v28  ;;  %745 = vmatmul.f32.gmra.mxu3 %v73_v29  ;;  %v90_v29 = vld [vmem:[#allocation2 + $0x170] sm:$0xff] }
  0xa5   :  { %265 = vmatmul.f32.gmra.mxu0 %v74_v30  ;;  %426 = vmatmul.f32.gmra.mxu1 %v75_v31 }
  0xa6   :  { %587 = vmatmul.f32.gmra.mxu2 %v74_v30  ;;  %748 = vmatmul.f32.gmra.mxu3 %v75_v31  ;;  %v91_v30 = vld [vmem:[#allocation2 + $0x178] sm:$0xff] }
  0xaa   :  { %v1354_v32 = vpop.f32.mrf.mxu0  ;;  %v1356_v33 = vpop.f32.mrf.mxu1 }
  0xad   :  { %268 = vmatmul.f32.gmra.mxu0 %v76_v34  ;;  %429 = vmatmul.f32.gmra.mxu1 %v77_v35 }
  0xae   :  { %590 = vmatmul.f32.gmra.mxu2 %v76_v34  ;;  %751 = vmatmul.f32.gmra.mxu3 %v77_v35 }
  0xb1   :  { %v543_v36 = vpop.f32.mrf.mxu2  ;;  %v704_v37 = vpop.f32.mrf.mxu3 }
  0xb2   :  { %v705_v38 = vadd.f32 %v704_v37, %v543_v36  ;;  %v1358_v39 = vpop.f32.mrf.mxu0  ;;  %v1360_v40 = vpop.f32.mrf.mxu1 }
  0xb4   :  { %v849_v50 = vmax.f32 %v705_v38, 0.0 }
  0xb5   :  { %271 = vmatmul.f32.gmra.mxu0 %v78_v41  ;;  %432 = vmatmul.f32.gmra.mxu1 %v79_v42 }
  0xb6   :  { %593 = vmatmul.f32.gmra.mxu2 %v78_v41  ;;  %754 = vmatmul.f32.gmra.mxu3 %v79_v42 }
  0xb9   :  { %v546_v43 = vpop.f32.mrf.mxu2  ;;  %v707_v44 = vpop.f32.mrf.mxu3 }
  0xba   :  { %v708_v45 = vadd.f32 %v707_v44, %v546_v43  ;;  %v1362_v46 = vpop.f32.mrf.mxu0  ;;  %v1364_v47 = vpop.f32.mrf.mxu1  ;;  %v92_v44 = vld [vmem:[#allocation2 + $0x180] sm:$0xff] }
  0xbc   :  { %v851_v51 = vmax.f32 %v708_v45, 0.0  ;;  %v93_v45 = vld [vmem:[#allocation2 + $0x188] sm:$0xff] }
  0xbd   :  { %274 = vmatmul.f32.gmra.mxu0 %v80_v48  ;;  %435 = vmatmul.f32.gmra.mxu1 %v81_v49 }
  0xbe   :  { %v953_v52 = vadd.f32 %v851_v51, %v849_v50  ;;  %596 = vmatmul.f32.gmra.mxu2 %v80_v48  ;;  %757 = vmatmul.f32.gmra.mxu3 %v81_v49 }
  0xc1   :  { %v549_v53 = vpop.f32.mrf.mxu2  ;;  %v710_v54 = vpop.f32.mrf.mxu3 }
  0xc2   :  { %v711_v55 = vadd.f32 %v710_v54, %v549_v53  ;;  %v1366_v56 = vpop.f32.mrf.mxu0  ;;  %v1368_v57 = vpop.f32.mrf.mxu1 }
  0xc4   :  { %v853_v60 = vmax.f32 %v711_v55, 0.0 }
  0xc5   :  { %277 = vmatmul.f32.gmra.mxu0 %v82_v58  ;;  %438 = vmatmul.f32.gmra.mxu1 %v83_v59 }
  0xc6   :  { %v954_v61 = vadd.f32 %v953_v52, %v853_v60  ;;  %599 = vmatmul.f32.gmra.mxu2 %v82_v58  ;;  %760 = vmatmul.f32.gmra.mxu3 %v83_v59 }
  0xc9   :  { %v552_v62 = vpop.f32.mrf.mxu2  ;;  %v713_v63 = vpop.f32.mrf.mxu3 }
  0xca   :  { %v714_v0 = vadd.f32 %v713_v63, %v552_v62  ;;  %v1370_v1 = vpop.f32.mrf.mxu0  ;;  %v1372_v2 = vpop.f32.mrf.mxu1  ;;  %v95_v62 = vld [vmem:[#allocation2 + $0x198] sm:$0xff] }
  0xcc   :  { %v855_v5 = vmax.f32 %v714_v0, 0.0 }
  0xcd   :  { %280 = vmatmul.f32.gmra.mxu0 %v84_v3  ;;  %441 = vmatmul.f32.gmra.mxu1 %v85_v4 }
  0xce   :  { %v955_v6 = vadd.f32 %v954_v61, %v855_v5  ;;  %602 = vmatmul.f32.gmra.mxu2 %v84_v3  ;;  %763 = vmatmul.f32.gmra.mxu3 %v85_v4  ;;  %v94_v61 = vld [vmem:[#allocation2 + $0x190] sm:$0xff] }
  0xd0   :  { %v956_v34 = vrot.slane %v955_v6, 4 }
  0xd1   :  { %v555_v7 = vpop.f32.mrf.mxu2  ;;  %v716_v8 = vpop.f32.mrf.mxu3 }
  0xd2   :  { %v717_v9 = vadd.f32 %v716_v8, %v555_v7  ;;  %v1374_v10 = vpop.f32.mrf.mxu0  ;;  %v1376_v11 = vpop.f32.mrf.mxu1  ;;  %v957_v38 = vadd.f32 %v956_v34, %v955_v6 }
  0xd4   :  { %v857_v21 = vmax.f32 %v717_v9, 0.0  ;;  %v958_v49 = vrot.slane %v957_v38, 2 }
  0xd5   :  { %283 = vmatmul.f32.gmra.mxu0 %v86_v12  ;;  %444 = vmatmul.f32.gmra.mxu1 %v87_v13 }
  0xd6   :  { %605 = vmatmul.f32.gmra.mxu2 %v86_v12  ;;  %766 = vmatmul.f32.gmra.mxu3 %v87_v13  ;;  %v959_v54 = vadd.f32 %v958_v49, %v957_v38 }
  0xd8   :  { %v960_v0 = vrot.slane %v959_v54, 1 }
  0xd9   :  { %v558_v14 = vpop.f32.mrf.mxu2  ;;  %v719_v15 = vpop.f32.mrf.mxu3 }
  0xda   :  { %v720_v16 = vadd.f32 %v719_v15, %v558_v14  ;;  %v1378_v17 = vpop.f32.mrf.mxu0  ;;  %v1380_v18 = vpop.f32.mrf.mxu1  ;;  %v961_v7 = vadd.f32 %v960_v0, %v959_v54  ;;  %v96_v14 = vld [vmem:[#allocation2 + $0x1a0] sm:$0xff]  ;;  %v97_v15 = vld [vmem:[#allocation2 + $0x1a8] sm:$0xff] }
  0xdc   :  { %v859_v22 = vmax.f32 %v720_v16, 0.0 }
  0xdd   :  { %286 = vmatmul.f32.gmra.mxu0 %v88_v19  ;;  %447 = vmatmul.f32.gmra.mxu1 %v89_v20 }
  0xde   :  { %v971_v23 = vadd.f32 %v859_v22, %v857_v21  ;;  %608 = vmatmul.f32.gmra.mxu2 %v88_v19  ;;  %769 = vmatmul.f32.gmra.mxu3 %v89_v20 }
  0xe1   :  { %v561_v24 = vpop.f32.mrf.mxu2  ;;  %v722_v25 = vpop.f32.mrf.mxu3 }
  0xe2   :  { %v723_v26 = vadd.f32 %v722_v25, %v561_v24  ;;  %v1382_v27 = vpop.f32.mrf.mxu0  ;;  %v1384_v28 = vpop.f32.mrf.mxu1 }
  0xe4   :  { %v861_v31 = vmax.f32 %v723_v26, 0.0 }
  0xe5   :  { %289 = vmatmul.f32.gmra.mxu0 %v90_v29  ;;  %450 = vmatmul.f32.gmra.mxu1 %v91_v30 }
  0xe6   :  { %v972_v35 = vadd.f32 %v971_v23, %v861_v31  ;;  %611 = vmatmul.f32.gmra.mxu2 %v90_v29  ;;  %772 = vmatmul.f32.gmra.mxu3 %v91_v30  ;;  %v98_v29 = vld [vmem:[#allocation2 + $0x1b0] sm:$0xff]  ;;  %v99_v30 = vld [vmem:[#allocation2 + $0x1b8] sm:$0xff] }
  0xe9   :  { %v564_v36 = vpop.f32.mrf.mxu2  ;;  %v725_v37 = vpop.f32.mrf.mxu3 }
  0xea   :  { %v726_v41 = vadd.f32 %v725_v37, %v564_v36  ;;  %v1386_v42 = vpop.f32.mrf.mxu0  ;;  %v1388_v43 = vpop.f32.mrf.mxu1 }
  0xec   :  { %v863_v48 = vmax.f32 %v726_v41, 0.0 }
  0xed   :  { %292 = vmatmul.f32.gmra.mxu0 %v92_v44  ;;  %453 = vmatmul.f32.gmra.mxu1 %v93_v45 }
  0xee   :  { %v973_v50 = vadd.f32 %v972_v35, %v863_v48  ;;  %614 = vmatmul.f32.gmra.mxu2 %v92_v44  ;;  %775 = vmatmul.f32.gmra.mxu3 %v93_v45  ;;  %v100_v44 = vld [vmem:[#allocation2 + $0x1c0] sm:$0xff]  ;;  %v101_v45 = vld [vmem:[#allocation2 + $0x1c8] sm:$0xff] }
  0xf0   :  { %v974_v51 = vrot.slane %v973_v50, 4 }
  0xf1   :  { %v567_v52 = vpop.f32.mrf.mxu2  ;;  %v728_v53 = vpop.f32.mrf.mxu3 }
  0xf2   :  { %v975_v55 = vadd.f32 %v974_v51, %v973_v50  ;;  %v729_v58 = vadd.f32 %v728_v53, %v567_v52  ;;  %v1390_v59 = vpop.f32.mrf.mxu0  ;;  %v1392_v60 = vpop.f32.mrf.mxu1 }
  0xf4   :  { %v976_v63 = vrot.slane %v975_v55, 2  ;;  %v865_v19 = vmax.f32 %v729_v58, 0.0 }
  0xf5   :  { %295 = vmatmul.f32.gmra.mxu0 %v94_v61  ;;  %456 = vmatmul.f32.gmra.mxu1 %v95_v62 }
  0xf6   :  { %v977_v3 = vadd.f32 %v976_v63, %v975_v55  ;;  %617 = vmatmul.f32.gmra.mxu2 %v94_v61  ;;  %778 = vmatmul.f32.gmra.mxu3 %v95_v62  ;;  %v102_v61 = vld [vmem:[#allocation2 + $0x1d0] sm:$0xff]  ;;  %v103_v62 = vld [vmem:[#allocation2 + $0x1d8] sm:$0xff] }
  0xf8   :  { %v978_v4 = vrot.slane %v977_v3, 1 }
  0xf9   :  { %v570_v5 = vpop.f32.mrf.mxu2  ;;  %v731_v6 = vpop.f32.mrf.mxu3 }
  0xfa   :  { %v979_v8 = vadd.f32 %v978_v4, %v977_v3  ;;  %v732_v9 = vadd.f32 %v731_v6, %v570_v5  ;;  %v1394_v12 = vpop.f32.mrf.mxu0  ;;  %v1396_v13 = vpop.f32.mrf.mxu1 }
  0xfc   :  { %v1198_v16 = vsel %vm1184_vm0, %v979_v8, %v961_v7  ;;  %v867_v20 = vmax.f32 %v732_v9, 0.0 }
  0xfd   :  { %298 = vmatmul.f32.gmra.mxu0 %v96_v14  ;;  %459 = vmatmul.f32.gmra.mxu1 %v97_v15 }
  0xfe   :  { %v989_v21 = vadd.f32 %v867_v20, %v865_v19  ;;  %620 = vmatmul.f32.gmra.mxu2 %v96_v14  ;;  %781 = vmatmul.f32.gmra.mxu3 %v97_v15  ;;  %v104_v14 = vld [vmem:[#allocation2 + $0x1e0] sm:$0xff]  ;;  %v105_v15 = vld [vmem:[#allocation2 + $0x1e8] sm:$0xff] }
 0x101   :  { %v573_v22 = vpop.f32.mrf.mxu2  ;;  %v734_v23 = vpop.f32.mrf.mxu3 }
 0x102   :  { %v735_v24 = vadd.f32 %v734_v23, %v573_v22  ;;  %v1399_v25 = vpop.f32.mrf.mxu0  ;;  %v1401_v26 = vpop.f32.mrf.mxu1 }
 0x104   :  { %v869_v31 = vmax.f32 %v735_v24, 0.0 }
 0x105   :  { %301 = vmatmul.f32.gmra.mxu0 %v98_v29  ;;  %462 = vmatmul.f32.gmra.mxu1 %v99_v30 }
 0x106   :  { %v990_v34 = vadd.f32 %v989_v21, %v869_v31  ;;  %623 = vmatmul.f32.gmra.mxu2 %v98_v29  ;;  %784 = vmatmul.f32.gmra.mxu3 %v99_v30 }
 0x109   :  { %v576_v35 = vpop.f32.mrf.mxu2  ;;  %v737_v36 = vpop.f32.mrf.mxu3 }
 0x10a   :  { %v738_v37 = vadd.f32 %v737_v36, %v576_v35  ;;  %v1403_v38 = vpop.f32.mrf.mxu0  ;;  %v1405_v41 = vpop.f32.mrf.mxu1  ;;  %v107_v35 = vld [vmem:[#allocation2 + $0x1f8] sm:$0xff] }
 0x10c   :  { %v871_v48 = vmax.f32 %v738_v37, 0.0 }
 0x10d   :  { %304 = vmatmul.f32.gmra.mxu0 %v100_v44  ;;  %465 = vmatmul.f32.gmra.mxu1 %v101_v45 }
 0x10e   :  { %v991_v49 = vadd.f32 %v990_v34, %v871_v48  ;;  %626 = vmatmul.f32.gmra.mxu2 %v100_v44  ;;  %787 = vmatmul.f32.gmra.mxu3 %v101_v45  ;;  %v106_v34 = vld [vmem:[#allocation2 + $0x1f0] sm:$0xff] }
 0x110   :  { %v992_v50 = vrot.slane %v991_v49, 4 }
 0x111   :  { %v579_v51 = vpop.f32.mrf.mxu2  ;;  %v740_v52 = vpop.f32.mrf.mxu3 }
 0x112   :  { %v993_v53 = vadd.f32 %v992_v50, %v991_v49  ;;  %v741_v54 = vadd.f32 %v740_v52, %v579_v51  ;;  %v1407_v55 = vpop.f32.mrf.mxu0  ;;  %v1409_v58 = vpop.f32.mrf.mxu1  ;;  %v108_v50 = vld [vmem:[#allocation2 + $0x200] sm:$0xff]  ;;  %v109_v51 = vld [vmem:[#allocation2 + $0x208] sm:$0xff] }
 0x114   :  { %v994_v63 = vrot.slane %v993_v53, 2  ;;  %v873_v20 = vmax.f32 %v741_v54, 0.0 }
 0x115   :  { %307 = vmatmul.f32.gmra.mxu0 %v102_v61  ;;  %468 = vmatmul.f32.gmra.mxu1 %v103_v62 }
 0x116   :  { %v995_v0 = vadd.f32 %v994_v63, %v993_v53  ;;  %629 = vmatmul.f32.gmra.mxu2 %v102_v61  ;;  %790 = vmatmul.f32.gmra.mxu3 %v103_v62 }
 0x118   :  { %v996_v3 = vrot.slane %v995_v0, 1 }
 0x119   :  { %v582_v4 = vpop.f32.mrf.mxu2  ;;  %v743_v5 = vpop.f32.mrf.mxu3 }
 0x11a   :  { %v997_v6 = vadd.f32 %v996_v3, %v995_v0  ;;  %v744_v7 = vadd.f32 %v743_v5, %v582_v4  ;;  %v1411_v8 = vpop.f32.mrf.mxu0  ;;  %v1413_v9 = vpop.f32.mrf.mxu1  ;;  %v110_v5 = vld [vmem:[#allocation2 + $0x210] sm:$0xff] }
 0x11c   :  { %v1199_v19 = vsel %vm1186_vm1, %v997_v6, %v1198_v16  ;;  %v875_v21 = vmax.f32 %v744_v7, 0.0  ;;  %v111_v6 = vld [vmem:[#allocation2 + $0x218] sm:$0xff] }
 0x11d   :  { %310 = vmatmul.f32.gmra.mxu0 %v104_v14  ;;  %471 = vmatmul.f32.gmra.mxu1 %v105_v15 }
 0x11e   :  { %v1007_v22 = vadd.f32 %v875_v21, %v873_v20  ;;  %632 = vmatmul.f32.gmra.mxu2 %v104_v14  ;;  %793 = vmatmul.f32.gmra.mxu3 %v105_v15 }
 0x121   :  { %v585_v23 = vpop.f32.mrf.mxu2  ;;  %v746_v24 = vpop.f32.mrf.mxu3 }
 0x122   :  { %v747_v29 = vadd.f32 %v746_v24, %v585_v23  ;;  %v1416_v30 = vpop.f32.mrf.mxu0  ;;  %v1418_v31 = vpop.f32.mrf.mxu1 }
 0x124   :  { %v877_v36 = vmax.f32 %v747_v29, 0.0 }
 0x125   :  { %313 = vmatmul.f32.gmra.mxu0 %v106_v34  ;;  %474 = vmatmul.f32.gmra.mxu1 %v107_v35 }
 0x126   :  { %v1008_v16 = vadd.f32 %v1007_v22, %v877_v36  ;;  %635 = vmatmul.f32.gmra.mxu2 %v106_v34  ;;  %796 = vmatmul.f32.gmra.mxu3 %v107_v35  ;;  %v112_v34 = vld [vmem:[#allocation2 + $0x220] sm:$0xff]  ;;  %v113_v35 = vld [vmem:[#allocation2 + $0x228] sm:$0xff] }
 0x129   :  { %v588_v37 = vpop.f32.mrf.mxu2  ;;  %v749_v44 = vpop.f32.mrf.mxu3 }
 0x12a   :  { %v750_v45 = vadd.f32 %v749_v44, %v588_v37  ;;  %v1420_v48 = vpop.f32.mrf.mxu0  ;;  %v1422_v49 = vpop.f32.mrf.mxu1 }
 0x12c   :  { %v879_v52 = vmax.f32 %v750_v45, 0.0 }
 0x12d   :  { %316 = vmatmul.f32.gmra.mxu0 %v108_v50  ;;  %477 = vmatmul.f32.gmra.mxu1 %v109_v51 }
 0x12e   :  { %v1009_v53 = vadd.f32 %v1008_v16, %v879_v52  ;;  %638 = vmatmul.f32.gmra.mxu2 %v108_v50  ;;  %799 = vmatmul.f32.gmra.mxu3 %v109_v51 }
 0x130   :  { %v1010_v54 = vrot.slane %v1009_v53, 4 }
 0x131   :  { %v591_v61 = vpop.f32.mrf.mxu2  ;;  %v752_v62 = vpop.f32.mrf.mxu3 }
 0x132   :  { %v1011_v63 = vadd.f32 %v1010_v54, %v1009_v53  ;;  %v753_v0 = vadd.f32 %v752_v62, %v591_v61  ;;  %v1424_v3 = vpop.f32.mrf.mxu0  ;;  %v1426_v4 = vpop.f32.mrf.mxu1  ;;  %v114_v54 = vld [vmem:[#allocation2 + $0x230] sm:$0xff]  ;;  %v115_v61 = vld [vmem:[#allocation2 + $0x238] sm:$0xff] }
 0x134   :  { %v1012_v7 = vrot.slane %v1011_v63, 2  ;;  %v881_v16 = vmax.f32 %v753_v0, 0.0 }
 0x135   :  { %319 = vmatmul.f32.gmra.mxu0 %v110_v5  ;;  %480 = vmatmul.f32.gmra.mxu1 %v111_v6 }
 0x136   :  { %v1013_v14 = vadd.f32 %v1012_v7, %v1011_v63  ;;  %641 = vmatmul.f32.gmra.mxu2 %v110_v5  ;;  %802 = vmatmul.f32.gmra.mxu3 %v111_v6 }
 0x138   :  { %v1014_v15 = vrot.slane %v1013_v14, 1 }
 0x139   :  { %v594_v20 = vpop.f32.mrf.mxu2  ;;  %v755_v21 = vpop.f32.mrf.mxu3 }
 0x13a   :  { %v1015_v22 = vadd.f32 %v1014_v15, %v1013_v14  ;;  %v756_v23 = vadd.f32 %v755_v21, %v594_v20  ;;  %v1428_v24 = vpop.f32.mrf.mxu0  ;;  %v1430_v29 = vpop.f32.mrf.mxu1  ;;  %v116_v14 = vld [vmem:[#allocation2 + $0x240] sm:$0xff]  ;;  %v117_v15 = vld [vmem:[#allocation2 + $0x248] sm:$0xff] }
 0x13c   :  { %v1200_v36 = vsel %vm1188_vm2, %v1015_v22, %v1199_v19  ;;  %v883_v37 = vmax.f32 %v756_v23, 0.0 }
 0x13d   :  { %322 = vmatmul.f32.gmra.mxu0 %v112_v34  ;;  %483 = vmatmul.f32.gmra.mxu1 %v113_v35 }
 0x13e   :  { %v1025_v44 = vadd.f32 %v883_v37, %v881_v16  ;;  %644 = vmatmul.f32.gmra.mxu2 %v112_v34  ;;  %805 = vmatmul.f32.gmra.mxu3 %v113_v35 }
 0x141   :  { %v597_v45 = vpop.f32.mrf.mxu2  ;;  %v758_v50 = vpop.f32.mrf.mxu3 }
 0x142   :  { %v759_v51 = vadd.f32 %v758_v50, %v597_v45  ;;  %v1433_v52 = vpop.f32.mrf.mxu0  ;;  %v1435_v53 = vpop.f32.mrf.mxu1  ;;  %v118_v45 = vld [vmem:[#allocation2 + $0x250] sm:$0xff]  ;;  %v119_v50 = vld [vmem:[#allocation2 + $0x258] sm:$0xff] }
 0x144   :  { %v885_v62 = vmax.f32 %v759_v51, 0.0 }
 0x145   :  { %325 = vmatmul.f32.gmra.mxu0 %v114_v54  ;;  %486 = vmatmul.f32.gmra.mxu1 %v115_v61 }
 0x146   :  { %v1026_v19 = vadd.f32 %v1025_v44, %v885_v62  ;;  %647 = vmatmul.f32.gmra.mxu2 %v114_v54  ;;  %808 = vmatmul.f32.gmra.mxu3 %v115_v61 }
 0x149   :  { %v600_v63 = vpop.f32.mrf.mxu2  ;;  %v761_v0 = vpop.f32.mrf.mxu3 }
 0x14a   :  { %v762_v5 = vadd.f32 %v761_v0, %v600_v63  ;;  %v1437_v6 = vpop.f32.mrf.mxu0  ;;  %v1439_v7 = vpop.f32.mrf.mxu1 }
 0x14c   :  { %v887_v20 = vmax.f32 %v762_v5, 0.0 }
 0x14d   :  { %328 = vmatmul.f32.gmra.mxu0 %v116_v14  ;;  %489 = vmatmul.f32.gmra.mxu1 %v117_v15 }
 0x14e   :  { %v1027_v21 = vadd.f32 %v1026_v19, %v887_v20  ;;  %650 = vmatmul.f32.gmra.mxu2 %v116_v14  ;;  %811 = vmatmul.f32.gmra.mxu3 %v117_v15  ;;  %v120_v15 = vld [vmem:[#allocation2 + $0x260] sm:$0xff]  ;;  %v121_v20 = vld [vmem:[#allocation2 + $0x268] sm:$0xff] }
 0x150   :  { %v1028_v22 = vrot.slane %v1027_v21, 4 }
 0x151   :  { %v603_v23 = vpop.f32.mrf.mxu2  ;;  %v764_v34 = vpop.f32.mrf.mxu3 }
 0x152   :  { %v1029_v35 = vadd.f32 %v1028_v22, %v1027_v21  ;;  %v765_v16 = vadd.f32 %v764_v34, %v603_v23  ;;  %v1441_v37 = vpop.f32.mrf.mxu0  ;;  %v1443_v44 = vpop.f32.mrf.mxu1 }
 0x154   :  { %v1030_v51 = vrot.slane %v1029_v35, 2  ;;  %v889_v23 = vmax.f32 %v765_v16, 0.0 }
 0x155   :  { %331 = vmatmul.f32.gmra.mxu0 %v118_v45  ;;  %492 = vmatmul.f32.gmra.mxu1 %v119_v50 }
 0x156   :  { %v1031_v54 = vadd.f32 %v1030_v51, %v1029_v35  ;;  %653 = vmatmul.f32.gmra.mxu2 %v118_v45  ;;  %814 = vmatmul.f32.gmra.mxu3 %v119_v50 }
 0x158   :  { %v1032_v61 = vrot.slane %v1031_v54, 1 }
 0x159   :  { %v606_v62 = vpop.f32.mrf.mxu2  ;;  %v767_v19 = vpop.f32.mrf.mxu3 }
 0x15a   :  { %v1033_v63 = vadd.f32 %v1032_v61, %v1031_v54  ;;  %v768_v0 = vadd.f32 %v767_v19, %v606_v62  ;;  %v287_v5 = vpop.f32.mrf.mxu0  ;;  %v448_v14 = vpop.f32.mrf.mxu1  ;;  %v122_v62 = vld [vmem:[#allocation2 + $0x270] sm:$0xff]  ;;  %v123_v19 = vld [vmem:[#allocation2 + $0x278] sm:$0xff] }
 0x15b   :  { %v1445_v21 = vadd.f32 %v448_v14, %v287_v5 }
 0x15c   :  { %v1201_v22 = vsel %vm1190_vm3, %v1033_v63, %v1200_v36  ;;  %v891_v34 = vmax.f32 %v768_v0, 0.0 }
 0x15d   :  { %1598 = vst [vmem:[#allocation11_spill] sm:$0xff] %v1445_v21  ;;  %334 = vmatmul.f32.gmra.mxu0 %v120_v15  ;;  %495 = vmatmul.f32.gmra.mxu1 %v121_v20 }
 0x15e   :  { %v1043_v35 = vadd.f32 %v891_v34, %v889_v23  ;;  %656 = vmatmul.f32.gmra.mxu2 %v120_v15  ;;  %817 = vmatmul.f32.gmra.mxu3 %v121_v20  ;;  %v124_v20 = vld [vmem:[#allocation2 + $0x280] sm:$0xff]  ;;  %v125_v23 = vld [vmem:[#allocation2 + $0x288] sm:$0xff] }
 0x161   :  { %v609_v45 = vpop.f32.mrf.mxu2  ;;  %v770_v50 = vpop.f32.mrf.mxu3 }
 0x162   :  { %v771_v51 = vadd.f32 %v770_v50, %v609_v45  ;;  %v1448_v54 = vpop.f32.mrf.mxu0  ;;  %v1450_v61 = vpop.f32.mrf.mxu1 }
 0x163   :  { %1599 = vst [vmem:[#allocation12_spill] sm:$0xff] %v1450_v61 }
 0x164   :  { %v893_v5 = vmax.f32 %v771_v51, 0.0 }
 0x165   :  { %337 = vmatmul.f32.gmra.mxu0 %v122_v62  ;;  %498 = vmatmul.f32.gmra.mxu1 %v123_v19 }
 0x166   :  { %v1044_v36 = vadd.f32 %v1043_v35, %v893_v5  ;;  %659 = vmatmul.f32.gmra.mxu2 %v122_v62  ;;  %820 = vmatmul.f32.gmra.mxu3 %v123_v19 }
 0x169   :  { %v612_v16 = vpop.f32.mrf.mxu2  ;;  %v773_v63 = vpop.f32.mrf.mxu3 }
 0x16a   :  { %v774_v0 = vadd.f32 %v773_v63, %v612_v16  ;;  %v1452_v14 = vpop.f32.mrf.mxu0  ;;  %v1454_v15 = vpop.f32.mrf.mxu1  ;;  %v126_v16 = vld [vmem:[#allocation2 + $0x290] sm:$0xff]  ;;  %v127_v63 = vld [vmem:[#allocation2 + $0x298] sm:$0xff] }
 0x16c   :  { %v895_v34 = vmax.f32 %v774_v0, 0.0 }
 0x16d   :  { %340 = vmatmul.f32.gmra.mxu0 %v124_v20  ;;  %501 = vmatmul.f32.gmra.mxu1 %v125_v23 }
 0x16e   :  { %v1045_v45 = vadd.f32 %v1044_v36, %v895_v34  ;;  %662 = vmatmul.f32.gmra.mxu2 %v124_v20  ;;  %823 = vmatmul.f32.gmra.mxu3 %v125_v23 }
 0x170   :  { %v1046_v50 = vrot.slane %v1045_v45, 4 }
 0x171   :  { %v1456_v51 = vpop.f32.mrf.mxu2  ;;  %v1458_v35 = vpop.f32.mrf.mxu3 }
 0x172   :  { %1600 = vst [vmem:[#allocation13_spill] sm:$0xff] %v1456_v51  ;;  %v1047_v62 = vadd.f32 %v1046_v50, %v1045_v45  ;;  %v1460_v19 = vpop.f32.mrf.mxu0  ;;  %v1462_v5 = vpop.f32.mrf.mxu1  ;;  %v128_v50 = vld [vmem:[#allocation2 + $0x2a0] sm:$0xff]  ;;  %v129_v51 = vld [vmem:[#allocation2 + $0x2a8] sm:$0xff] }
 0x173   :  { %1601 = vst [vmem:[#allocation14_spill] sm:$0xff] %v1458_v35 }
 0x174   :  { %v1048_v21 = vrot.slane %v1047_v62, 2 }
 0x175   :  { %343 = vmatmul.f32.gmra.mxu0 %v126_v16  ;;  %504 = vmatmul.f32.gmra.mxu1 %v127_v63 }
 0x176   :  { %v1049_v0 = vadd.f32 %v1048_v21, %v1047_v62  ;;  %665 = vmatmul.f32.gmra.mxu2 %v126_v16  ;;  %826 = vmatmul.f32.gmra.mxu3 %v127_v63  ;;  %v386_v21 = vadd.f32 %v1360_v40, %v1358_v39  ;;  %v398_v62 = vadd.f32 %v1376_v11, %v1374_v10 }
 0x177   :  { %v383_v16 = vadd.f32 %v1356_v33, %v1354_v32  ;;  %v389_v63 = vadd.f32 %v1364_v47, %v1362_v46  ;;  %v392_v10 = vadd.f32 %v1368_v57, %v1366_v56  ;;  %v404_v32 = vadd.f32 %v1384_v28, %v1382_v27  ;;  %v130_v47 = vld [vmem:[#allocation2 + $0x2b0] sm:$0xff] }
 0x178   :  { %v1050_v36 = vrot.slane %v1049_v0, 1  ;;  %v850_v40 = vmax.f32 %v386_v21, 0.0  ;;  %v858_v11 = vmax.f32 %v398_v62, 0.0  ;;  %v422_v62 = vadd.f32 %v1409_v58, %v1407_v55 }
 0x179   :  { %v1464_v20 = vpop.f32.mrf.mxu2  ;;  %v1466_v23 = vpop.f32.mrf.mxu3  ;;  %v854_v57 = vmax.f32 %v392_v10, 0.0  ;;  %v862_v28 = vmax.f32 %v404_v32, 0.0  ;;  %v431_v32 = vadd.f32 %v1422_v49, %v1420_v48  ;;  %v455_v48 = vadd.f32 %v1454_v15, %v1452_v14  ;;  %v1603_v14 = vld [vmem:[#allocation11_spill] sm:$0xff] }
 0x17a   :  { %v1051_v34 = vadd.f32 %v1050_v36, %v1049_v0  ;;  %v1468_v35 = vpop.f32.mrf.mxu0  ;;  %v1470_v45 = vpop.f32.mrf.mxu1  ;;  %v401_v0 = vadd.f32 %v1380_v18, %v1378_v17  ;;  %v848_v17 = vmax.f32 %v383_v16, 0.0  ;;  %v852_v18 = vmax.f32 %v389_v63, 0.0 }
 0x17b   :  { %v413_v16 = vadd.f32 %v1396_v13, %v1394_v12  ;;  %v434_v12 = vadd.f32 %v1426_v4, %v1424_v3  ;;  %v874_v10 = vmax.f32 %v422_v62, 0.0  ;;  %v437_v3 = vadd.f32 %v1430_v29, %v1428_v24 }
 0x17c   :  { %v1473_v61 = vsel %vm1192_vm4, %v1051_v34, %v1201_v22  ;;  %v395_v22 = vadd.f32 %v1372_v2, %v1370_v1  ;;  %v131_v1 = vld [vmem:[#allocation2 + $0x2b8] sm:$0xff]  ;;  %v410_v2 = vadd.f32 %v1392_v60, %v1390_v59  ;;  %v860_v34 = vmax.f32 %v401_v0, 0.0 }
 0x17d   :  { %346 = vmatmul.f32.gmra.mxu0 %v128_v50  ;;  %507 = vmatmul.f32.gmra.mxu1 %v129_v51  ;;  %v944_v56 = vadd.f32 %v850_v40, %v848_v17  ;;  %v458_v4 = vadd.f32 %v1462_v5, %v1460_v19  ;;  %v443_v17 = vadd.f32 %v1439_v7, %v1437_v6  ;;  %v880_v7 = vmax.f32 %v431_v32, 0.0 }
 0x17e   :  { %668 = vmatmul.f32.gmra.mxu2 %v128_v50  ;;  %829 = vmatmul.f32.gmra.mxu3 %v129_v51  ;;  %v856_v51 = vmax.f32 %v395_v22, 0.0  ;;  %v407_v50 = vadd.f32 %v1388_v43, %v1386_v42  ;;  %v866_v21 = vmax.f32 %v410_v2, 0.0  ;;  %v416_v42 = vadd.f32 %v1401_v26, %v1399_v25  ;;  %v132_v26 = vld [vmem:[#allocation2 + $0x2c0] sm:$0xff] }
 0x17f   :  { %v945_v59 = vadd.f32 %v944_v56, %v852_v18  ;;  %v419_v43 = vadd.f32 %v1405_v41, %v1403_v38  ;;  %v425_v22 = vadd.f32 %v1413_v9, %v1411_v8  ;;  %v133_v38 = vld [vmem:[#allocation2 + $0x2c8] sm:$0xff]  ;;  %v428_v8 = vadd.f32 %v1418_v31, %v1416_v30 }
 0x180   :  { %v962_v27 = vadd.f32 %v858_v11, %v856_v51  ;;  %v864_v63 = vmax.f32 %v407_v50, 0.0  ;;  %v446_v9 = vadd.f32 %v1443_v44, %v1441_v37  ;;  %v868_v11 = vmax.f32 %v413_v16, 0.0  ;;  %v1602_v44 = vld [vmem:[#allocation12_spill] sm:$0xff] }
 0x181   :  { %v1487_v36 = vpop.f32.mrf.mxu2  ;;  %v1489_v39 = vpop.f32.mrf.mxu3  ;;  %v1515_v55 = vadd.f32 %v945_v59, %v854_v57  ;;  %v876_v2 = vmax.f32 %v425_v22, 0.0  ;;  %v882_v30 = vmax.f32 %v434_v12, 0.0  ;;  %v440_v31 = vadd.f32 %v1435_v53, %v1433_v52  ;;  %v1604_v22 = vld [vmem:[#allocation13_spill] sm:$0xff]  ;;  %v1605_v12 = vld [vmem:[#allocation14_spill] sm:$0xff] }
 0x182   :  { %v1495_v33 = vpop.f32.mrf.mxu0  ;;  %v463_v46 = vpop.f32.mrf.mxu1  ;;  %v963_v60 = vadd.f32 %v962_v27, %v860_v34  ;;  %v980_v41 = vadd.f32 %v866_v21, %v864_v63  ;;  %v461_v49 = vadd.f32 %v1470_v45, %v1468_v35  ;;  %v878_v29 = vmax.f32 %v428_v8, 0.0  ;;  %v135_v21 = vld [vmem:[#allocation2 + $0x2d8] sm:$0xff] }
 0x183   :  { %v890_v37 = vmax.f32 %v446_v9, 0.0  ;;  %v452_v6 = vadd.f32 %v1602_v44, %v1448_v54  ;;  %v884_v19 = vmax.f32 %v437_v3, 0.0  ;;  %v898_v5 = vmax.f32 %v458_v4, 0.0 }
 0x184   :  { %v1517_v58 = vadd.f32 %v963_v60, %v862_v28  ;;  %v464_v18 = vadd.f32 %v463_v46, %v1495_v33  ;;  %v981_v52 = vadd.f32 %v980_v41, %v868_v11  ;;  %v888_v51 = vmax.f32 %v443_v17, 0.0  ;;  %v134_v28 = vld [vmem:[#allocation2 + $0x2d0] sm:$0xff] }
 0x185   :  { %349 = vmatmul.f32.gmra.mxu0 %v130_v47  ;;  %510 = vmatmul.f32.gmra.mxu1 %v131_v1  ;;  %v892_v15 = vmax.f32 %v1603_v14, 0.0  ;;  %v1016_v45 = vadd.f32 %v882_v30, %v880_v7  ;;  %v886_v50 = vmax.f32 %v440_v31, 0.0  ;;  %v896_v56 = vmax.f32 %v455_v48, 0.0  ;;  %v136_v48 = vld [vmem:[#allocation2 + $0x2e0] sm:$0xff] }
 0x186   :  { %671 = vmatmul.f32.gmra.mxu2 %v130_v47  ;;  %832 = vmatmul.f32.gmra.mxu3 %v131_v1  ;;  %v870_v47 = vmax.f32 %v416_v42, 0.0  ;;  %v872_v1 = vmax.f32 %v419_v43, 0.0  ;;  %v900_v57 = vmax.f32 %v461_v49, 0.0  ;;  %v1034_v59 = vadd.f32 %v890_v37, %v888_v51  ;;  %v137_v49 = vld [vmem:[#allocation2 + $0x2e8] sm:$0xff] }
 0x187   :  { %v894_v33 = vmax.f32 %v452_v6, 0.0  ;;  %v780_v46 = vadd.f32 %v1466_v23, %v1464_v20  ;;  %v1017_v16 = vadd.f32 %v1016_v45, %v884_v19  ;;  %v1052_v63 = vadd.f32 %v898_v5, %v896_v56 }
 0x188   :  { %v998_v24 = vadd.f32 %v874_v10, %v872_v1  ;;  %v982_v62 = vadd.f32 %v981_v52, %v870_v47  ;;  %v902_v42 = vmax.f32 %v464_v18, 0.0  ;;  %v1035_v43 = vadd.f32 %v1034_v59, %v892_v15  ;;  %v138_v59 = vld [vmem:[#allocation2 + $0x2f0] sm:$0xff] }
 0x189   :  { %v1511_v0 = vpop.f32.mrf.mxu2  ;;  %v1513_v40 = vpop.f32.mrf.mxu3  ;;  %v965_v41 = vrot.slane %v1517_v58, 4  ;;  %v1018_v10 = vadd.f32 %v1017_v16, %v886_v50  ;;  %v1053_v8 = vadd.f32 %v1052_v63, %v900_v57  ;;  %v899_v23 = vmax.f32 %v780_v46, 0.0 }
 0x18a   :  { %v1521_v13 = vpop.f32.mrf.mxu0  ;;  %v1523_v25 = vpop.f32.mrf.mxu1  ;;  %v999_v53 = vadd.f32 %v998_v24, %v876_v2  ;;  %v1036_v20 = vadd.f32 %v1035_v43, %v894_v33  ;;  %v786_v9 = vadd.f32 %v1513_v40, %v1511_v0  ;;  %v947_v11 = vrot.slane %v1515_v55, 4  ;;  %v139_v33 = vld [vmem:[#allocation2 + $0x2f8] sm:$0xff] }
 0x18b   :  { %v983_v32 = vrot.slane %v982_v62, 4  ;;  %v1054_v4 = vadd.f32 %v1053_v8, %v902_v42  ;;  %v966_v2 = vadd.f32 %v965_v41, %v1517_v58  ;;  %v1019_v17 = vrot.slane %v1018_v10, 4 }
 0x18c   :  { %v1000_v60 = vadd.f32 %v999_v53, %v878_v29  ;;  %v1037_v24 = vrot.slane %v1036_v20, 4  ;;  %v903_v37 = vmax.f32 %v786_v9, 0.0  ;;  %v948_v40 = vadd.f32 %v947_v11, %v1515_v55 }
 0x18d   :  { %352 = vmatmul.f32.gmra.mxu0 %v132_v26  ;;  %513 = vmatmul.f32.gmra.mxu1 %v133_v38  ;;  %v984_v44 = vadd.f32 %v983_v32, %v982_v62  ;;  %v1055_v7 = vrot.slane %v1054_v4, 4  ;;  %v467_v5 = vadd.f32 %v1523_v25, %v1521_v13  ;;  %v967_v58 = vrot.slane %v966_v2, 2 }
 0x18e   :  { %674 = vmatmul.f32.gmra.mxu2 %v132_v26  ;;  %835 = vmatmul.f32.gmra.mxu3 %v133_v38  ;;  %v777_v26 = vadd.f32 %v1605_v12, %v1604_v22  ;;  %v783_v38 = vadd.f32 %v1489_v39, %v1487_v36  ;;  %v1001_v3 = vrot.slane %v1000_v60, 4  ;;  %v1020_v52 = vadd.f32 %v1019_v17, %v1018_v10 }
 0x18f   :  { %v1038_v53 = vadd.f32 %v1037_v24, %v1036_v20  ;;  %v985_v15 = vrot.slane %v984_v44, 2  ;;  %v1056_v45 = vadd.f32 %v1055_v7, %v1054_v4  ;;  %v949_v55 = vrot.slane %v948_v40, 2 }
 0x190   :  { %v897_v47 = vmax.f32 %v777_v26, 0.0  ;;  %v901_v36 = vmax.f32 %v783_v38, 0.0  ;;  %v1002_v6 = vadd.f32 %v1001_v3, %v1000_v60  ;;  %v904_v56 = vmax.f32 %v467_v5, 0.0 }
 0x191   :  { %v1547_v34 = vpop.f32.mrf.mxu2  ;;  %v1549_v35 = vpop.f32.mrf.mxu3  ;;  %v1021_v13 = vrot.slane %v1020_v52, 2  ;;  %v1039_v46 = vrot.slane %v1038_v53, 2  ;;  %v986_v42 = vadd.f32 %v985_v15, %v984_v44  ;;  %v1057_v43 = vrot.slane %v1056_v45, 2 }
 0x192   :  { %v308_v27 = vpop.f32.mrf.mxu0  ;;  %v469_v54 = vpop.f32.mrf.mxu1  ;;  %v1061_v29 = vadd.f32 %v899_v23, %v897_v47  ;;  %v1003_v50 = vrot.slane %v1002_v6, 2  ;;  %v789_v22 = vadd.f32 %v1549_v35, %v1547_v34  ;;  %v950_v26 = vadd.f32 %v949_v55, %v948_v40 }
 0x193   :  { %v470_v0 = vadd.f32 %v469_v54, %v308_v27  ;;  %v1022_v20 = vadd.f32 %v1021_v13, %v1020_v52  ;;  %v1040_v9 = vadd.f32 %v1039_v46, %v1038_v53  ;;  %v987_v3 = vrot.slane %v986_v42, 1 }
 0x194   :  { %v1062_v19 = vadd.f32 %v1061_v29, %v901_v36  ;;  %v1004_v38 = vadd.f32 %v1003_v50, %v1002_v6  ;;  %v1058_v4 = vadd.f32 %v1057_v43, %v1056_v45  ;;  %v905_v47 = vmax.f32 %v789_v22, 0.0 }
 0x195   :  { %355 = vmatmul.f32.gmra.mxu0 %v134_v28  ;;  %516 = vmatmul.f32.gmra.mxu1 %v135_v21  ;;  %v906_v14 = vmax.f32 %v470_v0, 0.0  ;;  %v951_v34 = vrot.slane %v950_v26, 1  ;;  %v1041_v29 = vrot.slane %v1040_v9, 1  ;;  %v988_v44 = vadd.f32 %v987_v3, %v986_v42 }
 0x196   :  { %677 = vmatmul.f32.gmra.mxu2 %v134_v28  ;;  %838 = vmatmul.f32.gmra.mxu3 %v135_v21  ;;  %v1063_v51 = vadd.f32 %v1062_v19, %v903_v37  ;;  %v968_v28 = vadd.f32 %v967_v58, %v966_v2  ;;  %v1005_v35 = vrot.slane %v1004_v38, 1  ;;  %v1059_v6 = vrot.slane %v1058_v4, 1 }
 0x197   :  { %v1070_v16 = vadd.f32 %v906_v14, %v904_v56  ;;  %v952_v5 = vadd.f32 %v951_v34, %v950_v26  ;;  %v1042_v14 = vadd.f32 %v1041_v29, %v1040_v9 }
 0x198   :  { %v1064_v60 = vrot.slane %v1063_v51, 4  ;;  %v969_v8 = vrot.slane %v968_v28, 1  ;;  %v1060_v50 = vadd.f32 %v1059_v6, %v1058_v4 }
 0x199   :  { %v630_v39 = vpop.f32.mrf.mxu2  ;;  %v791_v1 = vpop.f32.mrf.mxu3 }
 0x19a   :  { %v311_v30 = vpop.f32.mrf.mxu0  ;;  %v472_v31 = vpop.f32.mrf.mxu1  ;;  %v792_v25 = vadd.f32 %v791_v1, %v630_v39  ;;  %v1065_v11 = vadd.f32 %v1064_v60, %v1063_v51  ;;  %v970_v17 = vadd.f32 %v969_v8, %v968_v28 }
 0x19b   :  { %v473_v18 = vadd.f32 %v472_v31, %v311_v30  ;;  %v1023_v30 = vrot.slane %v1022_v20, 1 }
 0x19c   :  { %v907_v23 = vmax.f32 %v792_v25, 0.0  ;;  %v1066_v37 = vrot.slane %v1065_v11, 2  ;;  %v1185_v51 = vsel %vm1184_vm0, %v970_v17, %v952_v5 }
 0x19d   :  { %358 = vmatmul.f32.gmra.mxu0 %v136_v48  ;;  %519 = vmatmul.f32.gmra.mxu1 %v137_v49  ;;  %v908_v57 = vmax.f32 %v473_v18, 0.0  ;;  %v1006_v18 = vadd.f32 %v1005_v35, %v1004_v38  ;;  %v1024_v52 = vadd.f32 %v1023_v30, %v1022_v20  ;;  %v1187_v55 = vsel %vm1186_vm1, %v988_v44, %v1185_v51 }
 0x19e   :  { %680 = vmatmul.f32.gmra.mxu2 %v136_v48  ;;  %841 = vmatmul.f32.gmra.mxu3 %v137_v49  ;;  %v1079_v31 = vadd.f32 %v907_v23, %v905_v47  ;;  %v1067_v15 = vadd.f32 %v1066_v37, %v1065_v11 }
 0x19f   :  { %v1071_v41 = vadd.f32 %v1070_v16, %v908_v57  ;;  %v1189_v57 = vsel %vm1188_vm2, %v1006_v18, %v1187_v55 }
 0x1a0   :  { %v1191_v13 = vsel %vm1190_vm3, %v1024_v52, %v1189_v57  ;;  %v1068_v46 = vrot.slane %v1067_v15, 1 }
 0x1a1   :  { %v633_v27 = vpop.f32.mrf.mxu2  ;;  %v794_v54 = vpop.f32.mrf.mxu3 }
 0x1a2   :  { %v314_v21 = vpop.f32.mrf.mxu0  ;;  %v475_v62 = vpop.f32.mrf.mxu1  ;;  %v795_v12 = vadd.f32 %v794_v54, %v633_v27  ;;  %v1069_v38 = vadd.f32 %v1068_v46, %v1067_v15 }
 0x1a3   :  { %v476_v63 = vadd.f32 %v475_v62, %v314_v21 }
 0x1a4   :  { %v909_v36 = vmax.f32 %v795_v12, 0.0  ;;  %v1203_v3 = vsel %vm1194_vm5, %v1069_v38, %v1473_v61 }
 0x1a5   :  { %v910_v10 = vmax.f32 %v476_v63, 0.0  ;;  %361 = vmatmul.f32.gmra.mxu0 %v138_v59  ;;  %522 = vmatmul.f32.gmra.mxu1 %v139_v33 }
 0x1a6   :  { %683 = vmatmul.f32.gmra.mxu2 %v138_v59  ;;  %844 = vmatmul.f32.gmra.mxu3 %v139_v33  ;;  %v1080_v7 = vadd.f32 %v1079_v31, %v909_v36  ;;  %v1193_v33 = vsel %vm1192_vm4, %v1042_v14, %v1191_v13 }
 0x1a7   :  { %v1072_v32 = vadd.f32 %v1071_v41, %v910_v10  ;;  %v1195_v63 = vsel %vm1194_vm5, %v1060_v50, %v1193_v33 }
 0x1a9   :  { %v1073_v39 = vrot.slane %v1072_v32, 4  ;;  %v636_v1 = vpop.f32.mrf.mxu2  ;;  %v797_v2 = vpop.f32.mrf.mxu3 }
 0x1aa   :  { %v798_v48 = vadd.f32 %v797_v2, %v636_v1  ;;  %v317_v49 = vpop.f32.mrf.mxu0  ;;  %v478_v24 = vpop.f32.mrf.mxu1 }
 0x1ab   :  { %v1074_v0 = vadd.f32 %v1073_v39, %v1072_v32  ;;  %v479_v40 = vadd.f32 %v478_v24, %v317_v49 }
 0x1ac   :  { %v911_v19 = vmax.f32 %v798_v48, 0.0 }
 0x1ad   :  { %v1075_v58 = vrot.slane %v1074_v0, 2  ;;  %v912_v43 = vmax.f32 %v479_v40, 0.0 }
 0x1ae   :  { %v1081_v53 = vadd.f32 %v1080_v7, %v911_v19 }
 0x1af   :  { %v1076_v45 = vadd.f32 %v1075_v58, %v1074_v0 }
 0x1b0   :  { %v1082_v56 = vrot.slane %v1081_v53, 4 }
 0x1b1   :  { %v1077_v27 = vrot.slane %v1076_v45, 1  ;;  %v639_v54 = vpop.f32.mrf.mxu2  ;;  %v800_v28 = vpop.f32.mrf.mxu3 }
 0x1b2   :  { %v1083_v25 = vadd.f32 %v1082_v56, %v1081_v53  ;;  %v801_v21 = vadd.f32 %v800_v28, %v639_v54  ;;  %v320_v62 = vpop.f32.mrf.mxu0  ;;  %v481_v59 = vpop.f32.mrf.mxu1 }
 0x1b3   :  { %v1078_v60 = vadd.f32 %v1077_v27, %v1076_v45  ;;  %v482_v16 = vadd.f32 %v481_v59, %v320_v62 }
 0x1b4   :  { %v1084_v42 = vrot.slane %v1083_v25, 2  ;;  %v913_v47 = vmax.f32 %v801_v21, 0.0 }
 0x1b5   :  { %v914_v22 = vmax.f32 %v482_v16, 0.0  ;;  %v1197_v12 = vsel %vm1196_vm6, %v1078_v60, %v1195_v63 }
 0x1b6   :  { %v1085_v26 = vadd.f32 %v1084_v42, %v1083_v25  ;;  %1215 = vst [vmem:[#allocation7] sm:$0xff] %v1197_v12 }
 0x1b7   :  { %v1088_v41 = vadd.f32 %v914_v22, %v912_v43 }
 0x1b8   :  { %v1086_v10 = vrot.slane %v1085_v26, 1 }
 0x1b9   :  { %v642_v8 = vpop.f32.mrf.mxu2  ;;  %v803_v20 = vpop.f32.mrf.mxu3 }
 0x1ba   :  { %v1087_v23 = vadd.f32 %v1086_v10, %v1085_v26  ;;  %v804_v9 = vadd.f32 %v803_v20, %v642_v8  ;;  %v323_v11 = vpop.f32.mrf.mxu0  ;;  %v484_v32 = vpop.f32.mrf.mxu1 }
 0x1bb   :  { %v485_v4 = vadd.f32 %v484_v32, %v323_v11 }
 0x1bc   :  { %v915_v36 = vmax.f32 %v804_v9, 0.0  ;;  %v1204_v34 = vsel %vm1196_vm6, %v1087_v23, %v1203_v3 }
 0x1bd   :  { %v916_v35 = vmax.f32 %v485_v4, 0.0  ;;  %1216 = vst [vmem:[#allocation7 + $0x8] sm:$0xff] %v1204_v34 }
 0x1be   :  { %v1097_v39 = vadd.f32 %v915_v36, %v913_v47 }
 0x1bf   :  { %v1089_v1 = vadd.f32 %v1088_v41, %v916_v35 }
 0x1c1   :  { %v645_v2 = vpop.f32.mrf.mxu2  ;;  %v806_v17 = vpop.f32.mrf.mxu3 }
 0x1c2   :  { %v807_v30 = vadd.f32 %v806_v17, %v645_v2  ;;  %v326_v31 = vpop.f32.mrf.mxu0  ;;  %v487_v48 = vpop.f32.mrf.mxu1 }
 0x1c3   :  { %v488_v49 = vadd.f32 %v487_v48, %v326_v31 }
 0x1c4   :  { %v917_v24 = vmax.f32 %v807_v30, 0.0 }
 0x1c5   :  { %v918_v29 = vmax.f32 %v488_v49, 0.0 }
 0x1c6   :  { %v1098_v37 = vadd.f32 %v1097_v39, %v917_v24 }
 0x1c7   :  { %v1090_v0 = vadd.f32 %v1089_v1, %v918_v29 }
 0x1c9   :  { %v648_v61 = vpop.f32.mrf.mxu2  ;;  %v809_v40 = vpop.f32.mrf.mxu3  ;;  %v1091_v33 = vrot.slane %v1090_v0, 4 }
 0x1ca   :  { %v810_v44 = vadd.f32 %v809_v40, %v648_v61  ;;  %v329_v6 = vpop.f32.mrf.mxu0  ;;  %v490_v7 = vpop.f32.mrf.mxu1 }
 0x1cb   :  { %v491_v19 = vadd.f32 %v490_v7, %v329_v6  ;;  %v1092_v22 = vadd.f32 %v1091_v33, %v1090_v0 }
 0x1cc   :  { %v919_v5 = vmax.f32 %v810_v44, 0.0 }
 0x1cd   :  { %v920_v45 = vmax.f32 %v491_v19, 0.0  ;;  %v1093_v8 = vrot.slane %v1092_v22, 2 }
 0x1ce   :  { %v1099_v18 = vadd.f32 %v1098_v37, %v919_v5 }
 0x1cf   :  { %v1094_v36 = vadd.f32 %v1093_v8, %v1092_v22 }
 0x1d0   :  { %v1100_v41 = vrot.slane %v1099_v18, 4 }
 0x1d1   :  { %v651_v58 = vpop.f32.mrf.mxu2  ;;  %v812_v52 = vpop.f32.mrf.mxu3  ;;  %v1095_v17 = vrot.slane %v1094_v36, 1 }
 0x1d2   :  { %v813_v53 = vadd.f32 %v812_v52, %v651_v58  ;;  %v332_v51 = vpop.f32.mrf.mxu0  ;;  %v493_v14 = vpop.f32.mrf.mxu1  ;;  %v1101_v32 = vadd.f32 %v1100_v41, %v1099_v18 }
 0x1d3   :  { %v494_v15 = vadd.f32 %v493_v14, %v332_v51  ;;  %v1096_v40 = vadd.f32 %v1095_v17, %v1094_v36 }
 0x1d4   :  { %v921_v25 = vmax.f32 %v813_v53, 0.0  ;;  %v1102_v1 = vrot.slane %v1101_v32, 2 }
 0x1d5   :  { %v922_v55 = vmax.f32 %v494_v15, 0.0 }
 0x1d6   :  { %v1103_v29 = vadd.f32 %v1102_v1, %v1101_v32 }
 0x1d7   :  { %v1106_v50 = vadd.f32 %v922_v55, %v920_v45 }
 0x1d8   :  { %v1104_v19 = vrot.slane %v1103_v29, 1 }
 0x1d9   :  { %v654_v56 = vpop.f32.mrf.mxu2  ;;  %v815_v57 = vpop.f32.mrf.mxu3 }
 0x1da   :  { %v816_v27 = vadd.f32 %v815_v57, %v654_v56  ;;  %v335_v54 = vpop.f32.mrf.mxu0  ;;  %v496_v28 = vpop.f32.mrf.mxu1  ;;  %v1105_v53 = vadd.f32 %v1104_v19, %v1103_v29 }
 0x1db   :  { %v497_v13 = vadd.f32 %v496_v28, %v335_v54 }
 0x1dc   :  { %v923_v21 = vmax.f32 %v816_v27, 0.0 }
 0x1dd   :  { %v924_v62 = vmax.f32 %v497_v13, 0.0 }
 0x1de   :  { %v1115_v59 = vadd.f32 %v923_v21, %v921_v25 }
 0x1df   :  { %v1107_v46 = vadd.f32 %v1106_v50, %v924_v62 }
 0x1e1   :  { %v657_v60 = vpop.f32.mrf.mxu2  ;;  %v818_v16 = vpop.f32.mrf.mxu3 }
 0x1e2   :  { %v819_v63 = vadd.f32 %v818_v16, %v657_v60  ;;  %v338_v42 = vpop.f32.mrf.mxu0  ;;  %v499_v43 = vpop.f32.mrf.mxu1 }
 0x1e3   :  { %v500_v12 = vadd.f32 %v499_v43, %v338_v42 }
 0x1e4   :  { %v925_v26 = vmax.f32 %v819_v63, 0.0 }
 0x1e5   :  { %v926_v38 = vmax.f32 %v500_v12, 0.0 }
 0x1e6   :  { %v1116_v10 = vadd.f32 %v1115_v59, %v925_v26 }
 0x1e7   :  { %v1108_v20 = vadd.f32 %v1107_v46, %v926_v38 }
 0x1e9   :  { %v1109_v23 = vrot.slane %v1108_v20, 4  ;;  %v660_v9 = vpop.f32.mrf.mxu2  ;;  %v821_v11 = vpop.f32.mrf.mxu3 }
 0x1ea   :  { %v822_v3 = vadd.f32 %v821_v11, %v660_v9  ;;  %v341_v4 = vpop.f32.mrf.mxu0  ;;  %v502_v47 = vpop.f32.mrf.mxu1 }
 0x1eb   :  { %v1110_v34 = vadd.f32 %v1109_v23, %v1108_v20  ;;  %v503_v21 = vadd.f32 %v502_v47, %v341_v4 }
 0x1ec   :  { %v927_v35 = vmax.f32 %v822_v3, 0.0 }
 0x1ed   :  { %v1111_v39 = vrot.slane %v1110_v34, 2  ;;  %v928_v16 = vmax.f32 %v503_v21, 0.0 }
 0x1ee   :  { %v1117_v2 = vadd.f32 %v1116_v10, %v927_v35 }
 0x1ef   :  { %v1112_v30 = vadd.f32 %v1111_v39, %v1110_v34 }
 0x1f0   :  { %v1118_v31 = vrot.slane %v1117_v2, 4 }
 0x1f1   :  { %v1113_v48 = vrot.slane %v1112_v30, 1  ;;  %v663_v49 = vpop.f32.mrf.mxu2  ;;  %v824_v24 = vpop.f32.mrf.mxu3 }
 0x1f2   :  { %v1119_v37 = vadd.f32 %v1118_v31, %v1117_v2  ;;  %v344_v0 = vpop.f32.mrf.mxu0  ;;  %v505_v61 = vpop.f32.mrf.mxu1  ;;  %v825_v38 = vadd.f32 %v824_v24, %v663_v49 }
 0x1f3   :  { %v1114_v44 = vadd.f32 %v1113_v48, %v1112_v30  ;;  %v506_v25 = vadd.f32 %v505_v61, %v344_v0 }
 0x1f4   :  { %v1120_v6 = vrot.slane %v1119_v37, 2  ;;  %v929_v9 = vmax.f32 %v825_v38, 0.0 }
 0x1f5   :  { %v1578_v7 = vsel %vm1184_vm0, %v1114_v44, %v1096_v40  ;;  %v930_v59 = vmax.f32 %v506_v25, 0.0 }
 0x1f6   :  { %v1121_v5 = vadd.f32 %v1120_v6, %v1119_v37 }
 0x1f7   :  { %v1124_v12 = vadd.f32 %v930_v59, %v928_v16 }
 0x1f8   :  { %v1122_v18 = vrot.slane %v1121_v5, 1 }
 0x1f9   :  { %v666_v58 = vpop.f32.mrf.mxu2  ;;  %v827_v52 = vpop.f32.mrf.mxu3 }
 0x1fa   :  { %v1123_v51 = vadd.f32 %v1122_v18, %v1121_v5  ;;  %v347_v14 = vpop.f32.mrf.mxu0  ;;  %v508_v15 = vpop.f32.mrf.mxu1  ;;  %v828_v22 = vadd.f32 %v827_v52, %v666_v58 }
 0x1fb   :  { %v509_v62 = vadd.f32 %v508_v15, %v347_v14 }
 0x1fc   :  { %v1581_v45 = vsel %vm1184_vm0, %v1123_v51, %v1105_v53  ;;  %v931_v8 = vmax.f32 %v828_v22, 0.0 }
 0x1fd   :  { %v932_v63 = vmax.f32 %v509_v62, 0.0 }
 0x1fe   :  { %v1133_v36 = vadd.f32 %v931_v8, %v929_v9 }
 0x1ff   :  { %v1125_v10 = vadd.f32 %v1124_v12, %v932_v63 }
 0x201   :  { %v669_v55 = vpop.f32.mrf.mxu2  ;;  %v830_v50 = vpop.f32.mrf.mxu3 }
 0x202   :  { %v350_v56 = vpop.f32.mrf.mxu0  ;;  %v511_v57 = vpop.f32.mrf.mxu1  ;;  %v831_v41 = vadd.f32 %v830_v50, %v669_v55 }
 0x203   :  { %v512_v33 = vadd.f32 %v511_v57, %v350_v56 }
 0x204   :  { %v933_v11 = vmax.f32 %v831_v41, 0.0 }
 0x205   :  { %v934_v26 = vmax.f32 %v512_v33, 0.0 }
 0x206   :  { %v1134_v1 = vadd.f32 %v1133_v36, %v933_v11 }
 0x207   :  { %v1126_v23 = vadd.f32 %v1125_v10, %v934_v26 }
 0x209   :  { %v672_v27 = vpop.f32.mrf.mxu2  ;;  %v833_v54 = vpop.f32.mrf.mxu3  ;;  %v1127_v39 = vrot.slane %v1126_v23, 4 }
 0x20a   :  { %v353_v28 = vpop.f32.mrf.mxu0  ;;  %v514_v13 = vpop.f32.mrf.mxu1  ;;  %v834_v20 = vadd.f32 %v833_v54, %v672_v27 }
 0x20b   :  { %v515_v2 = vadd.f32 %v514_v13, %v353_v28  ;;  %v1128_v48 = vadd.f32 %v1127_v39, %v1126_v23 }
 0x20c   :  { %v935_v34 = vmax.f32 %v834_v20, 0.0 }
 0x20d   :  { %v936_v49 = vmax.f32 %v515_v2, 0.0  ;;  %v1129_v5 = vrot.slane %v1128_v48, 2 }
 0x20e   :  { %v1135_v30 = vadd.f32 %v1134_v1, %v935_v34 }
 0x20f   :  { %v1130_v55 = vadd.f32 %v1129_v5, %v1128_v48 }
 0x210   :  { %v1136_v44 = vrot.slane %v1135_v30, 4 }
 0x211   :  { %v675_v46 = vpop.f32.mrf.mxu2  ;;  %v836_v60 = vpop.f32.mrf.mxu3  ;;  %v1131_v62 = vrot.slane %v1130_v55, 1 }
 0x212   :  { %v356_v42 = vpop.f32.mrf.mxu0  ;;  %v517_v43 = vpop.f32.mrf.mxu1  ;;  %v837_v18 = vadd.f32 %v836_v60, %v675_v46  ;;  %v1137_v14 = vadd.f32 %v1136_v44, %v1135_v30 }
 0x213   :  { %v518_v35 = vadd.f32 %v517_v43, %v356_v42  ;;  %v1132_v42 = vadd.f32 %v1131_v62, %v1130_v55 }
 0x214   :  { %v937_v50 = vmax.f32 %v837_v18, 0.0  ;;  %v1138_v25 = vrot.slane %v1137_v14, 2 }
 0x215   :  { %v938_v31 = vmax.f32 %v518_v35, 0.0  ;;  %v1206_v41 = vsel %vm1186_vm1, %v1132_v42, %v1578_v7 }
 0x216   :  { %v1139_v16 = vadd.f32 %v1138_v25, %v1137_v14 }
 0x217   :  { %v1142_v6 = vadd.f32 %v938_v31, %v936_v49 }
 0x218   :  { %v1140_v26 = vrot.slane %v1139_v16, 1 }
 0x219   :  { %v678_v32 = vpop.f32.mrf.mxu2  ;;  %v839_v3 = vpop.f32.mrf.mxu3 }
 0x21a   :  { %v359_v4 = vpop.f32.mrf.mxu0  ;;  %v520_v47 = vpop.f32.mrf.mxu1  ;;  %v840_v0 = vadd.f32 %v839_v3, %v678_v32  ;;  %v1141_v23 = vadd.f32 %v1140_v26, %v1139_v16 }
 0x21b   :  { %v521_v17 = vadd.f32 %v520_v47, %v359_v4 }
 0x21c   :  { %v939_v51 = vmax.f32 %v840_v0, 0.0  ;;  %v1209_v32 = vsel %vm1186_vm1, %v1141_v23, %v1581_v45 }
 0x21d   :  { %v940_v24 = vmax.f32 %v521_v17, 0.0 }
 0x21e   :  { %v1151_v28 = vadd.f32 %v939_v51, %v937_v50 }
 0x21f   :  { %v1143_v52 = vadd.f32 %v1142_v6, %v940_v24 }
 0x221   :  { %v681_v29 = vpop.f32.mrf.mxu2  ;;  %v842_v37 = vpop.f32.mrf.mxu3 }
 0x222   :  { %v362_v61 = vpop.f32.mrf.mxu0  ;;  %v523_v40 = vpop.f32.mrf.mxu1  ;;  %v843_v58 = vadd.f32 %v842_v37, %v681_v29 }
 0x223   :  { %v524_v19 = vadd.f32 %v523_v40, %v362_v61 }
 0x224   :  { %v941_v56 = vmax.f32 %v843_v58, 0.0 }
 0x225   :  { %v942_v53 = vmax.f32 %v524_v19, 0.0 }
 0x226   :  { %v1152_v59 = vadd.f32 %v1151_v28, %v941_v56 }
 0x227   :  { %v1144_v15 = vadd.f32 %v1143_v52, %v942_v53 }
 0x229   :  { %v1145_v57 = vrot.slane %v1144_v15, 4  ;;  %v684_v27 = vpop.f32.mrf.mxu2  ;;  %v845_v54 = vpop.f32.mrf.mxu3 }
 0x22a   :  { %v846_v13 = vadd.f32 %v845_v54, %v684_v27 }
 0x22b   :  { %v1146_v21 = vadd.f32 %v1145_v57, %v1144_v15 }
 0x22c   :  { %v943_v33 = vmax.f32 %v846_v13, 0.0 }
 0x22d   :  { %v1147_v46 = vrot.slane %v1146_v21, 2 }
 0x22e   :  { %v1153_v60 = vadd.f32 %v1152_v59, %v943_v33 }
 0x22f   :  { %v1148_v63 = vadd.f32 %v1147_v46, %v1146_v21 }
 0x230   :  { %v1154_v43 = vrot.slane %v1153_v60, 4 }
 0x231   :  { %v1149_v22 = vrot.slane %v1148_v63, 1 }
 0x232   :  { %v1155_v12 = vadd.f32 %v1154_v43, %v1153_v60 }
 0x233   :  { %v1150_v38 = vadd.f32 %v1149_v22, %v1148_v63 }
 0x234   :  { %v1156_v10 = vrot.slane %v1155_v12, 2 }
 0x235   :  { %v1207_v8 = vsel %vm1188_vm2, %v1150_v38, %v1206_v41 }
 0x236   :  { %v1157_v20 = vadd.f32 %v1156_v10, %v1155_v12  ;;  %1217 = vst [vmem:[#allocation7 + $0x10] sm:$0xf] %v1207_v8 }
 0x238   :  { %v1158_v9 = vrot.slane %v1157_v20, 1 }
 0x23a   :  { %v1159_v11 = vadd.f32 %v1158_v9, %v1157_v20 }
 0x23c   :  { %v1210_v7 = vsel %vm1188_vm2, %v1159_v11, %v1209_v32 }
 0x23d   :  { %1218 = vst [vmem:[#allocation7 + $0x18] sm:$0xf] %v1210_v7 }
 0x23e   :  { %1231 = dma.vmem_to_hbm [thread:$0]  %s1224_s1, 512, %s1226_s23, [#allocation4], %s1323_s17, %s1323_s17, %s1324_s18  }
 0x23f   :  { %1320 = dma.done.wait [#allocation4], 512  }
 0x240   :  { %1321 = vsyncadd [#allocation4], 4294966784 }
 0x241   :  { %1236 = vsyncpa [#allocation3], 1 }
 0x242   :  { %1237 = vsyncpa [#allocation6], 1 }
 0x243   :  { %1238 = vsyncpa [#allocation4], 1 }

</bundles_post_ra>
